<compile_context>
chip_gen: v6e
topology: v6e:2x2x1
jax: 0.10.0
libtpu: 0.0.40
codegen_flags: <defaults>
</compile_context>

<pallas_src>
import jax
import jax.numpy as jnp
from jax.experimental import pallas as pl
from jax.experimental.pallas import tpu as pltpu


# --------------------------- fused Down kernel ------------------------------

def _make_down_kernel(n_b, Ho, Wo, Cin, Cout, Cp):
    """Builds the fused maxpool + double (conv3x3 + BN + ReLU) kernel.

    Per grid step (n_b batch elements):
      x_ref   : (n_b, Ho, 2, Wo, 2*Cin)  pool windows (free reshape of NHWC input)
      w1_ref  : (9, Cin, Cout)           conv1 weights, leading dim = (ky, kx)
      w2_ref  : (9, Cout, Cp)            conv2 weights, out-channels padded to Cp
      s*_ref, t*_ref                     conv bias + BatchNorm folded (scale, shift)
      o_ref   : (M, Cp)                  M = n_b*Ho*Wo, lane-dense (Cp = 128k)
      pad1_ref: (n_b, Ho+2, Wo, Cin)     VMEM scratch, H-padded pooled activation
      pad2_ref: (n_b, Ho+2, Wo, Cout)    VMEM scratch, H-padded conv1 activation
    """
    M = n_b * Ho * Wo

    def kernel(x_ref, w1_ref, s1_ref, t1_ref, w2_ref, s2_ref, t2_ref,
               o_ref, pad1_ref, pad2_ref):

        # ---- one-time zeroing of the H-halo rows (scratch persists) --------
        @pl.when(pl.program_id(0) == 0)
        def _init_borders():
            zb1 = jnp.zeros((n_b, 1, Wo, Cin), jnp.float32)
            zb2 = jnp.zeros((n_b, 1, Wo, Cout), jnp.float32)
            pad1_ref[:, 0:1, :, :] = zb1
            pad1_ref[:, Ho + 1:Ho + 2, :, :] = zb1
            pad2_ref[:, 0:1, :, :] = zb2
            pad2_ref[:, Ho + 1:Ho + 2, :, :] = zb2

        # ---- MaxPool2d(2): pure elementwise max over the 2x2 window --------
        x5 = x_ref[...]                                  # (n_b, Ho, 2, Wo, 2*Cin)
        vmax = jnp.maximum(x5[:, :, 0], x5[:, :, 1])     # rows 2i vs 2i+1
        pooled = jnp.maximum(vmax[..., :Cin], vmax[..., Cin:])   # cols 2j vs 2j+1

        def conv3x3_bn_relu(act, pad_ref, w_ref, s_ref, t_ref, c, co):
            # act: (n_b, Ho, Wo, c).  Write interior W-aligned (H offset only),
            # build kx-shifted variants with XLU roll + wrapped-column mask,
            # then 9 accumulating MXU matmuls (K = c each), BN + ReLU.
            pad_ref[:, 1:Ho + 1, :, :] = act.astype(pad_ref.dtype)
            xp = pad_ref[...]                            # (n_b, Ho+2, Wo, c)
            w_idx = jax.lax.broadcasted_iota(jnp.int32, xp.shape, 2)
            x_l = jnp.where(w_idx == 0, 0.0,
                            pltpu.roll(xp, shift=1, axis=2))        # reads col j-1
            x_r = jnp.where(w_idx == Wo - 1, 0.0,
                            pltpu.roll(xp, shift=Wo - 1, axis=2))   # reads col j+1
            variants = (x_l, xp, x_r)                    # kx = 0, 1, 2

            acc = jnp.zeros((M, co), jnp.float32)
            for ky in range(3):
                for kx in range(3):
                    # Leading-axis slice + layout-preserving reshape (Wo % 8 == 0).
                    a = variants[kx][:, ky:ky + Ho].reshape(M, c)
                    acc = acc + jnp.dot(a, w_ref[3 * ky + kx],
                                        preferred_element_type=jnp.float32)
            return jnp.maximum(acc * s_ref[...] + t_ref[...], 0.0)  # BN + ReLU

        y1 = conv3x3_bn_relu(pooled, pad1_ref, w1_ref, s1_ref, t1_ref, Cin, Cout)
        y2 = conv3x3_bn_relu(y1.reshape(n_b, Ho, Wo, Cout), pad2_ref,
                             w2_ref, s2_ref, t2_ref, Cout, Cp)

        o_ref[...] = y2.astype(o_ref.dtype)              # (M, Cp), unmasked store

    return kernel


# ------------------------------ Down module ---------------------------------

def _fold_bn(conv_bias, gamma, beta, running_mean, running_var, eps=1e-5):
    scale = gamma / jnp.sqrt(running_var + eps)
    shift = (conv_bias - running_mean) * scale + beta
    return scale, shift


def init_down_params(key, in_channels, out_channels):
    k1, k2, k3, k4 = jax.random.split(key, 4)
    return {
        # conv weights stored HWIO: (kh, kw, Cin, Cout)
        "w1": 0.1 * jax.random.normal(k1, (3, 3, in_channels, out_channels), jnp.float32),
        "b1": 0.1 * jax.random.normal(k2, (out_channels,), jnp.float32),
        "w2": 0.1 * jax.random.normal(k3, (3, 3, out_channels, out_channels), jnp.float32),
        "b2": 0.1 * jax.random.normal(k4, (out_channels,), jnp.float32),
        # BatchNorm params at PyTorch defaults: gamma=1, beta=0, mean=0, var=1
        "bn1": (jnp.ones(out_channels), jnp.zeros(out_channels),
                jnp.zeros(out_channels), jnp.ones(out_channels)),
        "bn2": (jnp.ones(out_channels), jnp.zeros(out_channels),
                jnp.zeros(out_channels), jnp.ones(out_channels)),
    }


def down_forward(params, x_nchw):
    N, Cin, H, W = x_nchw.shape
    Ho, Wo = H // 2, W // 2
    # PyTorch MaxPool2d(2) floor-truncates odd sizes: crop explicitly.
    x_nchw = x_nchw[:, :, :2 * Ho, :2 * Wo]
    Cout = params["w1"].shape[-1]
    HW = Ho * Wo

    # Fold batch elements into one grid step so the matmul M dim reaches >= 128
    # (fills the MXU rows and amortises per-grid-step overhead).
    n_b = N
    for d in range(1, N + 1):
        if N % d == 0:
            n_b = d
            if d * HW >= 128:
                break
    M = n_b * HW
    num_steps = N // n_b

    # Pad the *final* output channels up to a lane-dense multiple of 128 so the
    # output store is unmasked.  The intermediate (conv1) activation stays at
    # its logical width; it never leaves VMEM.
    Cp = max(128, ((Cout + 127) // 128) * 128)

    # NCHW -> NHWC, then a *contiguous* (free) reshape exposing the 2x2 pool
    # windows: (N, H, W, C) -> (N, Ho, 2, Wo, 2*C).  No strided gather in HBM.
    x = jnp.transpose(x_nchw, (0, 2, 3, 1)).reshape(N, Ho, 2, Wo, 2 * Cin)

    s1, t1 = _fold_bn(params["b1"], *params["bn1"])
    s2, t2 = _fold_bn(params["b2"], *params["bn2"])
    w1 = params["w1"].reshape(9, Cin, Cout)                       # leading = (ky, kx)
    w2 = jnp.pad(params["w2"],
                 ((0, 0), (0, 0), (0, 0), (0, Cp - Cout))).reshape(9, Cout, Cp)
    s2p = jnp.pad(s2, (0, Cp - Cout)).reshape(1, Cp)
    t2p = jnp.pad(t2, (0, Cp - Cout)).reshape(1, Cp)

    kernel = _make_down_kernel(n_b, Ho, Wo, Cin, Cout, Cp)

    out = pl.pallas_call(
        kernel,
        out_shape=jax.ShapeDtypeStruct((N * HW, Cp), x_nchw.dtype),
        grid=(num_steps,),
        in_specs=[
            pl.BlockSpec((n_b, Ho, 2, Wo, 2 * Cin), lambda i: (i, 0, 0, 0, 0)),
            pl.BlockSpec((9, Cin, Cout), lambda i: (0, 0, 0)),
            pl.BlockSpec((1, Cout), lambda i: (0, 0)),
            pl.BlockSpec((1, Cout), lambda i: (0, 0)),
            pl.BlockSpec((9, Cout, Cp), lambda i: (0, 0, 0)),
            pl.BlockSpec((1, Cp), lambda i: (0, 0)),
            pl.BlockSpec((1, Cp), lambda i: (0, 0)),
        ],
        out_specs=pl.BlockSpec((M, Cp), lambda i: (i, 0)),
        scratch_shapes=[
            pltpu.VMEM((n_b, Ho + 2, Wo, Cin), jnp.float32),
            pltpu.VMEM((n_b, Ho + 2, Wo, Cout), jnp.float32),
        ],
        compiler_params=pltpu.CompilerParams(
            # "arbitrary": the step-0 scratch-border init must precede later
            # steps on the same core.  (With these shapes there is one step.)
            dimension_semantics=("arbitrary",),
            vmem_limit_bytes=32 * 1024 * 1024,   # ample for these small blocks
        ),
    )(x, w1, s1.reshape(1, Cout), t1.reshape(1, Cout), w2, s2p, t2p)

    # (N*Ho*Wo, Cp) -> slice padded channels -> NCHW
    out = out[:, :Cout].reshape(N, Ho, Wo, Cout)
    return jnp.transpose(out, (0, 3, 1, 2))


# --------------------------- pure-JAX reference ------------------------------

def down_reference(params, x_nchw):
    N, Cin, H, W = x_nchw.shape
    x = x_nchw[:, :, :2 * (H // 2), :2 * (W // 2)]
    p = jnp.maximum(jnp.maximum(x[:, :, 0::2, 0::2], x[:, :, 0::2, 1::2]),
                    jnp.maximum(x[:, :, 1::2, 0::2], x[:, :, 1::2, 1::2]))

    def conv_bn_relu(h, w, b, bn, eps=1e-5):
        gamma, beta, mean, var = bn
        z = jax.lax.conv_general_dilated(
            h, w, window_strides=(1, 1), padding=((1, 1), (1, 1)),
            dimension_numbers=("NCHW", "HWIO", "NCHW"))
        z = z + b[None, :, None, None]
        z = (z - mean[None, :, None, None]) * (
            gamma[None, :, None, None] / jnp.sqrt(var[None, :, None, None] + eps)
        ) + beta[None, :, None, None]
        return jnp.maximum(z, 0.0)

    h = conv_bn_relu(p, params["w1"], params["b1"], params["bn1"])
    return conv_bn_relu(h, params["w2"], params["b2"], params["bn2"])


if __name__ == "__main__":
    key = jax.random.PRNGKey(0)
    k_param, k_x = jax.random.split(key)

    in_channels, out_channels = 4, 8
    N, H, W = 2, 16, 16

    params = init_down_params(k_param, in_channels, out_channels)
    x = jax.random.normal(k_x, (N, in_channels, H, W), jnp.float32)  # NCHW

    y = jax.jit(down_forward)(params, x)
    jax.block_until_ready(y)

    assert y.shape == (N, out_channels, H // 2, W // 2), y.shape
    assert bool(jnp.all(y >= 0.0))  # ReLU output

    # Tolerance tightened vs 5e-2; still allows for default-precision (multi-
    # pass bf16) MXU f32 matmul differences vs XLA's conv algorithm.
    y_ref = down_reference(params, x)
    assert jnp.allclose(y, y_ref, atol=2e-2, rtol=2e-2), \
        float(jnp.max(jnp.abs(y - y_ref)))

    print("KERNEL_OK")
</pallas_src>

<mosaic_0001>
module attributes {stable_mosaic.version = 11 : i64} {
  func.func @kernel(%arg0: i32, %arg1: memref<2x8x2x8x8xf32, #tpu.memory_space<vmem>>, %arg2: memref<9x4x8xf32, #tpu.memory_space<vmem>>, %arg3: memref<1x8xf32, #tpu.memory_space<vmem>>, %arg4: memref<1x8xf32, #tpu.memory_space<vmem>>, %arg5: memref<9x8x128xf32, #tpu.memory_space<vmem>>, %arg6: memref<1x128xf32, #tpu.memory_space<vmem>>, %arg7: memref<1x128xf32, #tpu.memory_space<vmem>>, %arg8: memref<128x128xf32, #tpu.memory_space<vmem>>, %arg9: memref<2x10x8x4xf32, #tpu.memory_space<vmem>>, %arg10: memref<2x10x8x8xf32, #tpu.memory_space<vmem>>) attributes {dimension_semantics = [#tpu.dimension_semantics<arbitrary>], iteration_bounds = array<i64: 1>, scalar_prefetch = 0 : i64, scratch_operands = 2 : i64, tpu.core_type = #tpu.core_type<tc>, window_params = [{transform_indices = @transform_0, window_bounds = array<i64: 2, 8, 2, 8, 8>}, {pipeline_mode = #tpu.pipeline_mode<synchronous>, transform_indices = @transform_1, window_bounds = array<i64: 9, 4, 8>}, {pipeline_mode = #tpu.pipeline_mode<synchronous>, transform_indices = @transform_2, window_bounds = array<i64: 1, 8>}, {pipeline_mode = #tpu.pipeline_mode<synchronous>, transform_indices = @transform_3, window_bounds = array<i64: 1, 8>}, {pipeline_mode = #tpu.pipeline_mode<synchronous>, transform_indices = @transform_4, window_bounds = array<i64: 9, 8, 128>}, {pipeline_mode = #tpu.pipeline_mode<synchronous>, transform_indices = @transform_5, window_bounds = array<i64: 1, 128>}, {pipeline_mode = #tpu.pipeline_mode<synchronous>, transform_indices = @transform_6, window_bounds = array<i64: 1, 128>}, {transform_indices = @transform_7, window_bounds = array<i64: 128, 128>}]} {
    %c0_i32 = arith.constant 0 : i32
    %0 = arith.cmpi eq, %arg0, %c0_i32 : i32
    %1 = arith.extui %0 : i1 to i32
    %c0_i32_0 = arith.constant 0 : i32
    %2 = arith.cmpi ne, %1, %c0_i32_0 : i32
    scf.if %2 {
      %cst_108 = arith.constant 0.000000e+00 : f32
      %166 = vector.broadcast %cst_108 : f32 to vector<2x1x8x4xf32>
      %cst_109 = arith.constant 0.000000e+00 : f32
      %167 = vector.broadcast %cst_109 : f32 to vector<2x1x8x8xf32>
      %c0_110 = arith.constant 0 : index
      %c0_111 = arith.constant 0 : index
      %c0_112 = arith.constant 0 : index
      %c0_113 = arith.constant 0 : index
      %168 = vector.load %arg9[%c0_110, %c0_111, %c0_112, %c0_113] : memref<2x10x8x4xf32, #tpu.memory_space<vmem>>, vector<2x1x8x4xf32>
      tpu.vector_store %arg9[%c0_110, %c0_111, %c0_112, %c0_113], %166 {strides = array<i32>} : memref<2x10x8x4xf32, #tpu.memory_space<vmem>>, vector<2x1x8x4xf32>,
      %c0_114 = arith.constant 0 : index
      %c9 = arith.constant 9 : index
      %c0_115 = arith.constant 0 : index
      %c0_116 = arith.constant 0 : index
      %169 = vector.load %arg9[%c0_114, %c9, %c0_115, %c0_116] : memref<2x10x8x4xf32, #tpu.memory_space<vmem>>, vector<2x1x8x4xf32>
      tpu.vector_store %arg9[%c0_114, %c9, %c0_115, %c0_116], %166 {strides = array<i32>} : memref<2x10x8x4xf32, #tpu.memory_space<vmem>>, vector<2x1x8x4xf32>,
      %c0_117 = arith.constant 0 : index
      %c0_118 = arith.constant 0 : index
      %c0_119 = arith.constant 0 : index
      %c0_120 = arith.constant 0 : index
      %170 = vector.load %arg10[%c0_117, %c0_118, %c0_119, %c0_120] : memref<2x10x8x8xf32, #tpu.memory_space<vmem>>, vector<2x1x8x8xf32>
      tpu.vector_store %arg10[%c0_117, %c0_118, %c0_119, %c0_120], %167 {strides = array<i32>} : memref<2x10x8x8xf32, #tpu.memory_space<vmem>>, vector<2x1x8x8xf32>,
      %c0_121 = arith.constant 0 : index
      %c9_122 = arith.constant 9 : index
      %c0_123 = arith.constant 0 : index
      %c0_124 = arith.constant 0 : index
      %171 = vector.load %arg10[%c0_121, %c9_122, %c0_123, %c0_124] : memref<2x10x8x8xf32, #tpu.memory_space<vmem>>, vector<2x1x8x8xf32>
      tpu.vector_store %arg10[%c0_121, %c9_122, %c0_123, %c0_124], %167 {strides = array<i32>} : memref<2x10x8x8xf32, #tpu.memory_space<vmem>>, vector<2x1x8x8xf32>,
    } else {
    }
    %c0 = arith.constant 0 : index
    %c0_1 = arith.constant 0 : index
    %c0_2 = arith.constant 0 : index
    %c0_3 = arith.constant 0 : index
    %c0_4 = arith.constant 0 : index
    %3 = vector.load %arg1[%c0, %c0_1, %c0_2, %c0_3, %c0_4] : memref<2x8x2x8x8xf32, #tpu.memory_space<vmem>>, vector<2x8x2x8x8xf32>
    %4 = vector.extract_strided_slice %3 {offsets = [0, 0, 0, 0, 0], sizes = [2, 8, 1, 8, 8], strides = [1, 1, 1, 1, 1]} : vector<2x8x2x8x8xf32> to vector<2x8x1x8x8xf32>
    %5 = vector.shape_cast %4 : vector<2x8x1x8x8xf32> to vector<2x8x8x8xf32>
    %6 = vector.extract_strided_slice %3 {offsets = [0, 0, 1, 0, 0], sizes = [2, 8, 1, 8, 8], strides = [1, 1, 1, 1, 1]} : vector<2x8x2x8x8xf32> to vector<2x8x1x8x8xf32>
    %7 = vector.shape_cast %6 : vector<2x8x1x8x8xf32> to vector<2x8x8x8xf32>
    %8 = arith.maximumf %5, %7 : vector<2x8x8x8xf32>
    %9 = vector.extract_strided_slice %8 {offsets = [0, 0, 0, 0], sizes = [2, 8, 8, 4], strides = [1, 1, 1, 1]} : vector<2x8x8x8xf32> to vector<2x8x8x4xf32>
    %10 = vector.extract_strided_slice %8 {offsets = [0, 0, 0, 4], sizes = [2, 8, 8, 4], strides = [1, 1, 1, 1]} : vector<2x8x8x8xf32> to vector<2x8x8x4xf32>
    %11 = arith.maximumf %9, %10 : vector<2x8x8x4xf32>
    %c0_5 = arith.constant 0 : index
    %c1 = arith.constant 1 : index
    %c0_6 = arith.constant 0 : index
    %c0_7 = arith.constant 0 : index
    %12 = vector.load %arg9[%c0_5, %c1, %c0_6, %c0_7] : memref<2x10x8x4xf32, #tpu.memory_space<vmem>>, vector<2x8x8x4xf32>
    tpu.vector_store %arg9[%c0_5, %c1, %c0_6, %c0_7], %11 {strides = array<i32>} : memref<2x10x8x4xf32, #tpu.memory_space<vmem>>, vector<2x8x8x4xf32>,
    %c0_8 = arith.constant 0 : index
    %c0_9 = arith.constant 0 : index
    %c0_10 = arith.constant 0 : index
    %c0_11 = arith.constant 0 : index
    %13 = vector.load %arg9[%c0_8, %c0_9, %c0_10, %c0_11] : memref<2x10x8x4xf32, #tpu.memory_space<vmem>>, vector<2x10x8x4xf32>
    %14 = tpu.iota {dimensions = array<i32: 2>} : vector<2x10x8x4xi32>
    %c0_i32_12 = arith.constant 0 : i32
    %15 = vector.broadcast %c0_i32_12 : i32 to vector<2x10x8x4xi32>
    %16 = arith.cmpi eq, %14, %15 : vector<2x10x8x4xi32>
    %c1_i32 = arith.constant 1 : i32
    %17 = tpu.dynamic_rotate %13 by %c1_i32 dim 2 : vector<2x10x8x4xf32>, i32 -> vector<2x10x8x4xf32>
    %cst = arith.constant 0.000000e+00 : f32
    %18 = vector.broadcast %cst : f32 to vector<2x10x8x4xf32>
    %19 = arith.select %16, %18, %17 : vector<2x10x8x4xi1>, vector<2x10x8x4xf32>
    %c7_i32 = arith.constant 7 : i32
    %20 = vector.broadcast %c7_i32 : i32 to vector<2x10x8x4xi32>
    %21 = arith.cmpi eq, %14, %20 : vector<2x10x8x4xi32>
    %c7_i32_13 = arith.constant 7 : i32
    %22 = tpu.dynamic_rotate %13 by %c7_i32_13 dim 2 : vector<2x10x8x4xf32>, i32 -> vector<2x10x8x4xf32>
    %cst_14 = arith.constant 0.000000e+00 : f32
    %23 = vector.broadcast %cst_14 : f32 to vector<2x10x8x4xf32>
    %24 = arith.select %21, %23, %22 : vector<2x10x8x4xi1>, vector<2x10x8x4xf32>
    %cst_15 = arith.constant 0.000000e+00 : f32
    %25 = vector.broadcast %cst_15 : f32 to vector<128x8xf32>
    %26 = vector.extract_strided_slice %19 {offsets = [0, 0, 0, 0], sizes = [2, 8, 8, 4], strides = [1, 1, 1, 1]} : vector<2x10x8x4xf32> to vector<2x8x8x4xf32>
    %27 = vector.shape_cast %26 : vector<2x8x8x4xf32> to vector<128x4xf32>
    %c0_16 = arith.constant 0 : index
    %c0_17 = arith.constant 0 : index
    %c0_18 = arith.constant 0 : index
    %28 = vector.load %arg2[%c0_16, %c0_17, %c0_18] : memref<9x4x8xf32, #tpu.memory_space<vmem>>, vector<1x4x8xf32>
    %29 = vector.shape_cast %28 : vector<1x4x8xf32> to vector<4x8xf32>
    %cst_19 = arith.constant dense<0.000000e+00> : vector<128x8xf32>
    %30 = tpu.matmul %27, %29, %cst_19 {dimension_numbers = #tpu.dot_dimension_numbers<[1], [0], [0], [1], [0, 0, 1, 1], [], []>} : vector<128x4xf32>, vector<4x8xf32>, vector<128x8xf32> -> vector<128x8xf32>
    %31 = arith.addf %25, %30 : vector<128x8xf32>
    %32 = vector.extract_strided_slice %13 {offsets = [0, 0, 0, 0], sizes = [2, 8, 8, 4], strides = [1, 1, 1, 1]} : vector<2x10x8x4xf32> to vector<2x8x8x4xf32>
    %33 = vector.shape_cast %32 : vector<2x8x8x4xf32> to vector<128x4xf32>
    %c1_20 = arith.constant 1 : index
    %c0_21 = arith.constant 0 : index
    %c0_22 = arith.constant 0 : index
    %34 = vector.load %arg2[%c1_20, %c0_21, %c0_22] : memref<9x4x8xf32, #tpu.memory_space<vmem>>, vector<1x4x8xf32>
    %35 = vector.shape_cast %34 : vector<1x4x8xf32> to vector<4x8xf32>
    %cst_23 = arith.constant dense<0.000000e+00> : vector<128x8xf32>
    %36 = tpu.matmul %33, %35, %cst_23 {dimension_numbers = #tpu.dot_dimension_numbers<[1], [0], [0], [1], [0, 0, 1, 1], [], []>} : vector<128x4xf32>, vector<4x8xf32>, vector<128x8xf32> -> vector<128x8xf32>
    %37 = arith.addf %31, %36 : vector<128x8xf32>
    %38 = vector.extract_strided_slice %24 {offsets = [0, 0, 0, 0], sizes = [2, 8, 8, 4], strides = [1, 1, 1, 1]} : vector<2x10x8x4xf32> to vector<2x8x8x4xf32>
    %39 = vector.shape_cast %38 : vector<2x8x8x4xf32> to vector<128x4xf32>
    %c2 = arith.constant 2 : index
    %c0_24 = arith.constant 0 : index
    %c0_25 = arith.constant 0 : index
    %40 = vector.load %arg2[%c2, %c0_24, %c0_25] : memref<9x4x8xf32, #tpu.memory_space<vmem>>, vector<1x4x8xf32>
    %41 = vector.shape_cast %40 : vector<1x4x8xf32> to vector<4x8xf32>
    %cst_26 = arith.constant dense<0.000000e+00> : vector<128x8xf32>
    %42 = tpu.matmul %39, %41, %cst_26 {dimension_numbers = #tpu.dot_dimension_numbers<[1], [0], [0], [1], [0, 0, 1, 1], [], []>} : vector<128x4xf32>, vector<4x8xf32>, vector<128x8xf32> -> vector<128x8xf32>
    %43 = arith.addf %37, %42 : vector<128x8xf32>
    %44 = vector.extract_strided_slice %19 {offsets = [0, 1, 0, 0], sizes = [2, 8, 8, 4], strides = [1, 1, 1, 1]} : vector<2x10x8x4xf32> to vector<2x8x8x4xf32>
    %45 = vector.shape_cast %44 : vector<2x8x8x4xf32> to vector<128x4xf32>
    %c3 = arith.constant 3 : index
    %c0_27 = arith.constant 0 : index
    %c0_28 = arith.constant 0 : index
    %46 = vector.load %arg2[%c3, %c0_27, %c0_28] : memref<9x4x8xf32, #tpu.memory_space<vmem>>, vector<1x4x8xf32>
    %47 = vector.shape_cast %46 : vector<1x4x8xf32> to vector<4x8xf32>
    %cst_29 = arith.constant dense<0.000000e+00> : vector<128x8xf32>
    %48 = tpu.matmul %45, %47, %cst_29 {dimension_numbers = #tpu.dot_dimension_numbers<[1], [0], [0], [1], [0, 0, 1, 1], [], []>} : vector<128x4xf32>, vector<4x8xf32>, vector<128x8xf32> -> vector<128x8xf32>
    %49 = arith.addf %43, %48 : vector<128x8xf32>
    %50 = vector.extract_strided_slice %13 {offsets = [0, 1, 0, 0], sizes = [2, 8, 8, 4], strides = [1, 1, 1, 1]} : vector<2x10x8x4xf32> to vector<2x8x8x4xf32>
    %51 = vector.shape_cast %50 : vector<2x8x8x4xf32> to vector<128x4xf32>
    %c4 = arith.constant 4 : index
    %c0_30 = arith.constant 0 : index
    %c0_31 = arith.constant 0 : index
    %52 = vector.load %arg2[%c4, %c0_30, %c0_31] : memref<9x4x8xf32, #tpu.memory_space<vmem>>, vector<1x4x8xf32>
    %53 = vector.shape_cast %52 : vector<1x4x8xf32> to vector<4x8xf32>
    %cst_32 = arith.constant dense<0.000000e+00> : vector<128x8xf32>
    %54 = tpu.matmul %51, %53, %cst_32 {dimension_numbers = #tpu.dot_dimension_numbers<[1], [0], [0], [1], [0, 0, 1, 1], [], []>} : vector<128x4xf32>, vector<4x8xf32>, vector<128x8xf32> -> vector<128x8xf32>
    %55 = arith.addf %49, %54 : vector<128x8xf32>
    %56 = vector.extract_strided_slice %24 {offsets = [0, 1, 0, 0], sizes = [2, 8, 8, 4], strides = [1, 1, 1, 1]} : vector<2x10x8x4xf32> to vector<2x8x8x4xf32>
    %57 = vector.shape_cast %56 : vector<2x8x8x4xf32> to vector<128x4xf32>
    %c5 = arith.constant 5 : index
    %c0_33 = arith.constant 0 : index
    %c0_34 = arith.constant 0 : index
    %58 = vector.load %arg2[%c5, %c0_33, %c0_34] : memref<9x4x8xf32, #tpu.memory_space<vmem>>, vector<1x4x8xf32>
    %59 = vector.shape_cast %58 : vector<1x4x8xf32> to vector<4x8xf32>
    %cst_35 = arith.constant dense<0.000000e+00> : vector<128x8xf32>
    %60 = tpu.matmul %57, %59, %cst_35 {dimension_numbers = #tpu.dot_dimension_numbers<[1], [0], [0], [1], [0, 0, 1, 1], [], []>} : vector<128x4xf32>, vector<4x8xf32>, vector<128x8xf32> -> vector<128x8xf32>
    %61 = arith.addf %55, %60 : vector<128x8xf32>
    %62 = vector.extract_strided_slice %19 {offsets = [0, 2, 0, 0], sizes = [2, 8, 8, 4], strides = [1, 1, 1, 1]} : vector<2x10x8x4xf32> to vector<2x8x8x4xf32>
    %63 = vector.shape_cast %62 : vector<2x8x8x4xf32> to vector<128x4xf32>
    %c6 = arith.constant 6 : index
    %c0_36 = arith.constant 0 : index
    %c0_37 = arith.constant 0 : index
    %64 = vector.load %arg2[%c6, %c0_36, %c0_37] : memref<9x4x8xf32, #tpu.memory_space<vmem>>, vector<1x4x8xf32>
    %65 = vector.shape_cast %64 : vector<1x4x8xf32> to vector<4x8xf32>
    %cst_38 = arith.constant dense<0.000000e+00> : vector<128x8xf32>
    %66 = tpu.matmul %63, %65, %cst_38 {dimension_numbers = #tpu.dot_dimension_numbers<[1], [0], [0], [1], [0, 0, 1, 1], [], []>} : vector<128x4xf32>, vector<4x8xf32>, vector<128x8xf32> -> vector<128x8xf32>
    %67 = arith.addf %61, %66 : vector<128x8xf32>
    %68 = vector.extract_strided_slice %13 {offsets = [0, 2, 0, 0], sizes = [2, 8, 8, 4], strides = [1, 1, 1, 1]} : vector<2x10x8x4xf32> to vector<2x8x8x4xf32>
    %69 = vector.shape_cast %68 : vector<2x8x8x4xf32> to vector<128x4xf32>
    %c7 = arith.constant 7 : index
    %c0_39 = arith.constant 0 : index
    %c0_40 = arith.constant 0 : index
    %70 = vector.load %arg2[%c7, %c0_39, %c0_40] : memref<9x4x8xf32, #tpu.memory_space<vmem>>, vector<1x4x8xf32>
    %71 = vector.shape_cast %70 : vector<1x4x8xf32> to vector<4x8xf32>
    %cst_41 = arith.constant dense<0.000000e+00> : vector<128x8xf32>
    %72 = tpu.matmul %69, %71, %cst_41 {dimension_numbers = #tpu.dot_dimension_numbers<[1], [0], [0], [1], [0, 0, 1, 1], [], []>} : vector<128x4xf32>, vector<4x8xf32>, vector<128x8xf32> -> vector<128x8xf32>
    %73 = arith.addf %67, %72 : vector<128x8xf32>
    %74 = vector.extract_strided_slice %24 {offsets = [0, 2, 0, 0], sizes = [2, 8, 8, 4], strides = [1, 1, 1, 1]} : vector<2x10x8x4xf32> to vector<2x8x8x4xf32>
    %75 = vector.shape_cast %74 : vector<2x8x8x4xf32> to vector<128x4xf32>
    %c8 = arith.constant 8 : index
    %c0_42 = arith.constant 0 : index
    %c0_43 = arith.constant 0 : index
    %76 = vector.load %arg2[%c8, %c0_42, %c0_43] : memref<9x4x8xf32, #tpu.memory_space<vmem>>, vector<1x4x8xf32>
    %77 = vector.shape_cast %76 : vector<1x4x8xf32> to vector<4x8xf32>
    %cst_44 = arith.constant dense<0.000000e+00> : vector<128x8xf32>
    %78 = tpu.matmul %75, %77, %cst_44 {dimension_numbers = #tpu.dot_dimension_numbers<[1], [0], [0], [1], [0, 0, 1, 1], [], []>} : vector<128x4xf32>, vector<4x8xf32>, vector<128x8xf32> -> vector<128x8xf32>
    %79 = arith.addf %73, %78 : vector<128x8xf32>
    %c0_45 = arith.constant 0 : index
    %c0_46 = arith.constant 0 : index
    %80 = vector.load %arg3[%c0_45, %c0_46] : memref<1x8xf32, #tpu.memory_space<vmem>>, vector<1x8xf32>
    %81 = vector.broadcast %80 : vector<1x8xf32> to vector<128x8xf32>
    %82 = arith.mulf %79, %81 : vector<128x8xf32>
    %c0_47 = arith.constant 0 : index
    %c0_48 = arith.constant 0 : index
    %83 = vector.load %arg4[%c0_47, %c0_48] : memref<1x8xf32, #tpu.memory_space<vmem>>, vector<1x8xf32>
    %84 = vector.broadcast %83 : vector<1x8xf32> to vector<128x8xf32>
    %85 = arith.addf %82, %84 : vector<128x8xf32>
    %cst_49 = arith.constant 0.000000e+00 : f32
    %86 = vector.broadcast %cst_49 : f32 to vector<128x8xf32>
    %87 = arith.maximumf %85, %86 : vector<128x8xf32>
    %88 = vector.shape_cast %87 : vector<128x8xf32> to vector<2x8x8x8xf32>
    %c0_50 = arith.constant 0 : index
    %c1_51 = arith.constant 1 : index
    %c0_52 = arith.constant 0 : index
    %c0_53 = arith.constant 0 : index
    %89 = vector.load %arg10[%c0_50, %c1_51, %c0_52, %c0_53] : memref<2x10x8x8xf32, #tpu.memory_space<vmem>>, vector<2x8x8x8xf32>
    tpu.vector_store %arg10[%c0_50, %c1_51, %c0_52, %c0_53], %88 {strides = array<i32>} : memref<2x10x8x8xf32, #tpu.memory_space<vmem>>, vector<2x8x8x8xf32>,
    %c0_54 = arith.constant 0 : index
    %c0_55 = arith.constant 0 : index
    %c0_56 = arith.constant 0 : index
    %c0_57 = arith.constant 0 : index
    %90 = vector.load %arg10[%c0_54, %c0_55, %c0_56, %c0_57] : memref<2x10x8x8xf32, #tpu.memory_space<vmem>>, vector<2x10x8x8xf32>
    %91 = tpu.iota {dimensions = array<i32: 2>} : vector<2x10x8x8xi32>
    %c0_i32_58 = arith.constant 0 : i32
    %92 = vector.broadcast %c0_i32_58 : i32 to vector<2x10x8x8xi32>
    %93 = arith.cmpi eq, %91, %92 : vector<2x10x8x8xi32>
    %c1_i32_59 = arith.constant 1 : i32
    %94 = tpu.dynamic_rotate %90 by %c1_i32_59 dim 2 : vector<2x10x8x8xf32>, i32 -> vector<2x10x8x8xf32>
    %cst_60 = arith.constant 0.000000e+00 : f32
    %95 = vector.broadcast %cst_60 : f32 to vector<2x10x8x8xf32>
    %96 = arith.select %93, %95, %94 : vector<2x10x8x8xi1>, vector<2x10x8x8xf32>
    %c7_i32_61 = arith.constant 7 : i32
    %97 = vector.broadcast %c7_i32_61 : i32 to vector<2x10x8x8xi32>
    %98 = arith.cmpi eq, %91, %97 : vector<2x10x8x8xi32>
    %c7_i32_62 = arith.constant 7 : i32
    %99 = tpu.dynamic_rotate %90 by %c7_i32_62 dim 2 : vector<2x10x8x8xf32>, i32 -> vector<2x10x8x8xf32>
    %cst_63 = arith.constant 0.000000e+00 : f32
    %100 = vector.broadcast %cst_63 : f32 to vector<2x10x8x8xf32>
    %101 = arith.select %98, %100, %99 : vector<2x10x8x8xi1>, vector<2x10x8x8xf32>
    %cst_64 = arith.constant 0.000000e+00 : f32
    %102 = vector.broadcast %cst_64 : f32 to vector<128x128xf32>
    %103 = vector.extract_strided_slice %96 {offsets = [0, 0, 0, 0], sizes = [2, 8, 8, 8], strides = [1, 1, 1, 1]} : vector<2x10x8x8xf32> to vector<2x8x8x8xf32>
    %104 = vector.shape_cast %103 : vector<2x8x8x8xf32> to vector<128x8xf32>
    %c0_65 = arith.constant 0 : index
    %c0_66 = arith.constant 0 : index
    %c0_67 = arith.constant 0 : index
    %105 = vector.load %arg5[%c0_65, %c0_66, %c0_67] : memref<9x8x128xf32, #tpu.memory_space<vmem>>, vector<1x8x128xf32>
    %106 = vector.shape_cast %105 : vector<1x8x128xf32> to vector<8x128xf32>
    %cst_68 = arith.constant dense<0.000000e+00> : vector<128x128xf32>
    %107 = tpu.matmul %104, %106, %cst_68 {dimension_numbers = #tpu.dot_dimension_numbers<[1], [0], [0], [1], [0, 0, 1, 1], [], []>} : vector<128x8xf32>, vector<8x128xf32>, vector<128x128xf32> -> vector<128x128xf32>
    %108 = arith.addf %102, %107 : vector<128x128xf32>
    %109 = vector.extract_strided_slice %90 {offsets = [0, 0, 0, 0], sizes = [2, 8, 8, 8], strides = [1, 1, 1, 1]} : vector<2x10x8x8xf32> to vector<2x8x8x8xf32>
    %110 = vector.shape_cast %109 : vector<2x8x8x8xf32> to vector<128x8xf32>
    %c1_69 = arith.constant 1 : index
    %c0_70 = arith.constant 0 : index
    %c0_71 = arith.constant 0 : index
    %111 = vector.load %arg5[%c1_69, %c0_70, %c0_71] : memref<9x8x128xf32, #tpu.memory_space<vmem>>, vector<1x8x128xf32>
    %112 = vector.shape_cast %111 : vector<1x8x128xf32> to vector<8x128xf32>
    %cst_72 = arith.constant dense<0.000000e+00> : vector<128x128xf32>
    %113 = tpu.matmul %110, %112, %cst_72 {dimension_numbers = #tpu.dot_dimension_numbers<[1], [0], [0], [1], [0, 0, 1, 1], [], []>} : vector<128x8xf32>, vector<8x128xf32>, vector<128x128xf32> -> vector<128x128xf32>
    %114 = arith.addf %108, %113 : vector<128x128xf32>
    %115 = vector.extract_strided_slice %101 {offsets = [0, 0, 0, 0], sizes = [2, 8, 8, 8], strides = [1, 1, 1, 1]} : vector<2x10x8x8xf32> to vector<2x8x8x8xf32>
    %116 = vector.shape_cast %115 : vector<2x8x8x8xf32> to vector<128x8xf32>
    %c2_73 = arith.constant 2 : index
    %c0_74 = arith.constant 0 : index
    %c0_75 = arith.constant 0 : index
    %117 = vector.load %arg5[%c2_73, %c0_74, %c0_75] : memref<9x8x128xf32, #tpu.memory_space<vmem>>, vector<1x8x128xf32>
    %118 = vector.shape_cast %117 : vector<1x8x128xf32> to vector<8x128xf32>
    %cst_76 = arith.constant dense<0.000000e+00> : vector<128x128xf32>
    %119 = tpu.matmul %116, %118, %cst_76 {dimension_numbers = #tpu.dot_dimension_numbers<[1], [0], [0], [1], [0, 0, 1, 1], [], []>} : vector<128x8xf32>, vector<8x128xf32>, vector<128x128xf32> -> vector<128x128xf32>
    %120 = arith.addf %114, %119 : vector<128x128xf32>
    %121 = vector.extract_strided_slice %96 {offsets = [0, 1, 0, 0], sizes = [2, 8, 8, 8], strides = [1, 1, 1, 1]} : vector<2x10x8x8xf32> to vector<2x8x8x8xf32>
    %122 = vector.shape_cast %121 : vector<2x8x8x8xf32> to vector<128x8xf32>
    %c3_77 = arith.constant 3 : index
    %c0_78 = arith.constant 0 : index
    %c0_79 = arith.constant 0 : index
    %123 = vector.load %arg5[%c3_77, %c0_78, %c0_79] : memref<9x8x128xf32, #tpu.memory_space<vmem>>, vector<1x8x128xf32>
    %124 = vector.shape_cast %123 : vector<1x8x128xf32> to vector<8x128xf32>
    %cst_80 = arith.constant dense<0.000000e+00> : vector<128x128xf32>
    %125 = tpu.matmul %122, %124, %cst_80 {dimension_numbers = #tpu.dot_dimension_numbers<[1], [0], [0], [1], [0, 0, 1, 1], [], []>} : vector<128x8xf32>, vector<8x128xf32>, vector<128x128xf32> -> vector<128x128xf32>
    %126 = arith.addf %120, %125 : vector<128x128xf32>
    %127 = vector.extract_strided_slice %90 {offsets = [0, 1, 0, 0], sizes = [2, 8, 8, 8], strides = [1, 1, 1, 1]} : vector<2x10x8x8xf32> to vector<2x8x8x8xf32>
    %128 = vector.shape_cast %127 : vector<2x8x8x8xf32> to vector<128x8xf32>
    %c4_81 = arith.constant 4 : index
    %c0_82 = arith.constant 0 : index
    %c0_83 = arith.constant 0 : index
    %129 = vector.load %arg5[%c4_81, %c0_82, %c0_83] : memref<9x8x128xf32, #tpu.memory_space<vmem>>, vector<1x8x128xf32>
    %130 = vector.shape_cast %129 : vector<1x8x128xf32> to vector<8x128xf32>
    %cst_84 = arith.constant dense<0.000000e+00> : vector<128x128xf32>
    %131 = tpu.matmul %128, %130, %cst_84 {dimension_numbers = #tpu.dot_dimension_numbers<[1], [0], [0], [1], [0, 0, 1, 1], [], []>} : vector<128x8xf32>, vector<8x128xf32>, vector<128x128xf32> -> vector<128x128xf32>
    %132 = arith.addf %126, %131 : vector<128x128xf32>
    %133 = vector.extract_strided_slice %101 {offsets = [0, 1, 0, 0], sizes = [2, 8, 8, 8], strides = [1, 1, 1, 1]} : vector<2x10x8x8xf32> to vector<2x8x8x8xf32>
    %134 = vector.shape_cast %133 : vector<2x8x8x8xf32> to vector<128x8xf32>
    %c5_85 = arith.constant 5 : index
    %c0_86 = arith.constant 0 : index
    %c0_87 = arith.constant 0 : index
    %135 = vector.load %arg5[%c5_85, %c0_86, %c0_87] : memref<9x8x128xf32, #tpu.memory_space<vmem>>, vector<1x8x128xf32>
    %136 = vector.shape_cast %135 : vector<1x8x128xf32> to vector<8x128xf32>
    %cst_88 = arith.constant dense<0.000000e+00> : vector<128x128xf32>
    %137 = tpu.matmul %134, %136, %cst_88 {dimension_numbers = #tpu.dot_dimension_numbers<[1], [0], [0], [1], [0, 0, 1, 1], [], []>} : vector<128x8xf32>, vector<8x128xf32>, vector<128x128xf32> -> vector<128x128xf32>
    %138 = arith.addf %132, %137 : vector<128x128xf32>
    %139 = vector.extract_strided_slice %96 {offsets = [0, 2, 0, 0], sizes = [2, 8, 8, 8], strides = [1, 1, 1, 1]} : vector<2x10x8x8xf32> to vector<2x8x8x8xf32>
    %140 = vector.shape_cast %139 : vector<2x8x8x8xf32> to vector<128x8xf32>
    %c6_89 = arith.constant 6 : index
    %c0_90 = arith.constant 0 : index
    %c0_91 = arith.constant 0 : index
    %141 = vector.load %arg5[%c6_89, %c0_90, %c0_91] : memref<9x8x128xf32, #tpu.memory_space<vmem>>, vector<1x8x128xf32>
    %142 = vector.shape_cast %141 : vector<1x8x128xf32> to vector<8x128xf32>
    %cst_92 = arith.constant dense<0.000000e+00> : vector<128x128xf32>
    %143 = tpu.matmul %140, %142, %cst_92 {dimension_numbers = #tpu.dot_dimension_numbers<[1], [0], [0], [1], [0, 0, 1, 1], [], []>} : vector<128x8xf32>, vector<8x128xf32>, vector<128x128xf32> -> vector<128x128xf32>
    %144 = arith.addf %138, %143 : vector<128x128xf32>
    %145 = vector.extract_strided_slice %90 {offsets = [0, 2, 0, 0], sizes = [2, 8, 8, 8], strides = [1, 1, 1, 1]} : vector<2x10x8x8xf32> to vector<2x8x8x8xf32>
    %146 = vector.shape_cast %145 : vector<2x8x8x8xf32> to vector<128x8xf32>
    %c7_93 = arith.constant 7 : index
    %c0_94 = arith.constant 0 : index
    %c0_95 = arith.constant 0 : index
    %147 = vector.load %arg5[%c7_93, %c0_94, %c0_95] : memref<9x8x128xf32, #tpu.memory_space<vmem>>, vector<1x8x128xf32>
    %148 = vector.shape_cast %147 : vector<1x8x128xf32> to vector<8x128xf32>
    %cst_96 = arith.constant dense<0.000000e+00> : vector<128x128xf32>
    %149 = tpu.matmul %146, %148, %cst_96 {dimension_numbers = #tpu.dot_dimension_numbers<[1], [0], [0], [1], [0, 0, 1, 1], [], []>} : vector<128x8xf32>, vector<8x128xf32>, vector<128x128xf32> -> vector<128x128xf32>
    %150 = arith.addf %144, %149 : vector<128x128xf32>
    %151 = vector.extract_strided_slice %101 {offsets = [0, 2, 0, 0], sizes = [2, 8, 8, 8], strides = [1, 1, 1, 1]} : vector<2x10x8x8xf32> to vector<2x8x8x8xf32>
    %152 = vector.shape_cast %151 : vector<2x8x8x8xf32> to vector<128x8xf32>
    %c8_97 = arith.constant 8 : index
    %c0_98 = arith.constant 0 : index
    %c0_99 = arith.constant 0 : index
    %153 = vector.load %arg5[%c8_97, %c0_98, %c0_99] : memref<9x8x128xf32, #tpu.memory_space<vmem>>, vector<1x8x128xf32>
    %154 = vector.shape_cast %153 : vector<1x8x128xf32> to vector<8x128xf32>
    %cst_100 = arith.constant dense<0.000000e+00> : vector<128x128xf32>
    %155 = tpu.matmul %152, %154, %cst_100 {dimension_numbers = #tpu.dot_dimension_numbers<[1], [0], [0], [1], [0, 0, 1, 1], [], []>} : vector<128x8xf32>, vector<8x128xf32>, vector<128x128xf32> -> vector<128x128xf32>
    %156 = arith.addf %150, %155 : vector<128x128xf32>
    %c0_101 = arith.constant 0 : index
    %c0_102 = arith.constant 0 : index
    %157 = vector.load %arg6[%c0_101, %c0_102] : memref<1x128xf32, #tpu.memory_space<vmem>>, vector<1x128xf32>
    %158 = vector.broadcast %157 : vector<1x128xf32> to vector<128x128xf32>
    %159 = arith.mulf %156, %158 : vector<128x128xf32>
    %c0_103 = arith.constant 0 : index
    %c0_104 = arith.constant 0 : index
    %160 = vector.load %arg7[%c0_103, %c0_104] : memref<1x128xf32, #tpu.memory_space<vmem>>, vector<1x128xf32>
    %161 = vector.broadcast %160 : vector<1x128xf32> to vector<128x128xf32>
    %162 = arith.addf %159, %161 : vector<128x128xf32>
    %cst_105 = arith.constant 0.000000e+00 : f32
    %163 = vector.broadcast %cst_105 : f32 to vector<128x128xf32>
    %164 = arith.maximumf %162, %163 : vector<128x128xf32>
    %c0_106 = arith.constant 0 : index
    %c0_107 = arith.constant 0 : index
    %165 = vector.load %arg8[%c0_106, %c0_107] : memref<128x128xf32, #tpu.memory_space<vmem>>, vector<128x128xf32>
    tpu.vector_store %arg8[%c0_106, %c0_107], %164 {strides = array<i32>} : memref<128x128xf32, #tpu.memory_space<vmem>>, vector<128x128xf32>,
    return
  }
  func.func @transform_0(%arg0: i32) -> (i32, i32, i32, i32, i32) {
    %c0_i32 = arith.constant 0 : i32
    %c0_i32_0 = arith.constant 0 : i32
    %c0_i32_1 = arith.constant 0 : i32
    %c0_i32_2 = arith.constant 0 : i32
    %c0_i32_3 = arith.constant 0 : i32
    return %arg0, %c0_i32, %c0_i32_0, %c0_i32_1, %c0_i32_2 : i32, i32, i32, i32, i32
  }
  func.func @transform_1(%arg0: i32) -> (i32, i32, i32) {
    %c0_i32 = arith.constant 0 : i32
    %c0_i32_0 = arith.constant 0 : i32
    %c0_i32_1 = arith.constant 0 : i32
    %c0_i32_2 = arith.constant 0 : i32
    return %c0_i32, %c0_i32_0, %c0_i32_1 : i32, i32, i32
  }
  func.func @transform_2(%arg0: i32) -> (i32, i32) {
    %c0_i32 = arith.constant 0 : i32
    %c0_i32_0 = arith.constant 0 : i32
    %c0_i32_1 = arith.constant 0 : i32
    return %c0_i32, %c0_i32_0 : i32, i32
  }
  func.func @transform_3(%arg0: i32) -> (i32, i32) {
    %c0_i32 = arith.constant 0 : i32
    %c0_i32_0 = arith.constant 0 : i32
    %c0_i32_1 = arith.constant 0 : i32
    return %c0_i32, %c0_i32_0 : i32, i32
  }
  func.func @transform_4(%arg0: i32) -> (i32, i32, i32) {
    %c0_i32 = arith.constant 0 : i32
    %c0_i32_0 = arith.constant 0 : i32
    %c0_i32_1 = arith.constant 0 : i32
    %c0_i32_2 = arith.constant 0 : i32
    return %c0_i32, %c0_i32_0, %c0_i32_1 : i32, i32, i32
  }
  func.func @transform_5(%arg0: i32) -> (i32, i32) {
    %c0_i32 = arith.constant 0 : i32
    %c0_i32_0 = arith.constant 0 : i32
    %c0_i32_1 = arith.constant 0 : i32
    return %c0_i32, %c0_i32_0 : i32, i32
  }
  func.func @transform_6(%arg0: i32) -> (i32, i32) {
    %c0_i32 = arith.constant 0 : i32
    %c0_i32_0 = arith.constant 0 : i32
    %c0_i32_1 = arith.constant 0 : i32
    return %c0_i32, %c0_i32_0 : i32, i32
  }
  func.func @transform_7(%arg0: i32) -> (i32, i32) {
    %c0_i32 = arith.constant 0 : i32
    %c0_i32_0 = arith.constant 0 : i32
    return %arg0, %c0_i32 : i32, i32
  }
}

</mosaic_0001>

<bundles_post_ra>
// kernel: down_forward.1
= control target key start
LH: loop header
LB: loop body
LE: loop exit
PB: predicated region body
PF: predicated region fallthrough
CT: control target
= control target key end

     0   :  { %vm30_vm0 = vcmask 31744   ;;  %v4903_v3 = vmov 0.0   ;;  %s4904_s17 = smov 124   ;;  %v208_v12 = vlaneseq  ;;  %vm343_vm1 = vcmask 1043456   ;;  %s6942_s0 = inlined_call_operand.vmem [shape: f32[2,8,2,8,8], index: 0, kind: input, shape index: {}]   ;;  %s6943_s1 = inlined_call_operand.vmem [shape: f32[9,4,8], index: 1, kind: input, shape index: {}]   ;;  %s6944_s4 = inlined_call_operand.vmem [shape: f32[9,8,128], index: 4, kind: input, shape index: {}]   ;;  %s6945_s2 = inlined_call_operand.vmem [shape: f32[1,8], index: 2, kind: input, shape index: {}]   ;;  %s6946_s3 = inlined_call_operand.vmem [shape: f32[1,8], index: 3, kind: input, shape index: {}]   ;;  %s6947_s5 = inlined_call_operand.vmem [shape: f32[1,128], index: 5, kind: input, shape index: {}]   ;;  %s6948_s6 = inlined_call_operand.vmem [shape: f32[1,128], index: 6, kind: input, shape index: {}]   ;;  %s6949_s7 = inlined_call_operand.vmem [shape: f32[128,128], index: 7, kind: output, shape index: {}]  }
   0x1   :  { %v42_v0 = vld [vmem:[%s6942_s0] sm:$0xff]  ;;  %v43_v1 = vld [vmem:[%s6942_s0 + $0x8] sm:$0xff]  ;;  %31 = vst.msk [vmem:[#allocation2] sm:$0xff] %vm30_vm0, %v4903_v3  ;;  %32 = vst.msk [vmem:[#allocation2 + $0x50] sm:$0xff] %vm30_vm0, %v4903_v3  ;;  %vm36_vm4 = vcmask 64512  }
   0x2   :  { %v46_v2 = vld [vmem:[%s6942_s0 + $0x20] sm:$0xff]  ;;  %34 = vst.msk [vmem:[#allocation2 + $0x48] sm:$0xff] %vm30_vm0, %v4903_v3  ;;  %35 = vst.msk [vmem:[#allocation2 + $0x98] sm:$0xff] %vm30_vm0, %v4903_v3  ;;  %v4962_v4 = vmax.f32 %v42_v0, %v43_v1  ;;  %v47_v5 = vld [vmem:[%s6942_s0 + $0x28] sm:$0xff]  ;;  %v5005_v19 = vshrl.u32 %v208_v12, 7 }
   0x3   :  { %v44_v6 = vld [vmem:[%s6942_s0 + $0x10] sm:$0xff]  ;;  %v45_v7 = vld [vmem:[%s6942_s0 + $0x18] sm:$0xff]  ;;  %v4973_v8 = vmax.f32 %v46_v2, %v47_v5  ;;  %v50_v14 = vld [vmem:[%s6942_s0 + $0x40] sm:$0xff]  ;;  %37 = vst.msk [vmem:[#allocation3] sm:$0xff] %vm36_vm4, %v4903_v3 }
   0x4   :  { %v48_v9 = vld [vmem:[%s6942_s0 + $0x30] sm:$0xff]  ;;  %v49_v10 = vld [vmem:[%s6942_s0 + $0x38] sm:$0xff]  ;;  %106 = vrot.lane.b32.xlu0 %v4962_v4, %s4904_s17  ;;  %v4983_v11 = vmax.f32 %v44_v6, %v45_v7  ;;  %v51_v15 = vld [vmem:[%s6942_s0 + $0x48] sm:$0xff]  ;;  %6955 = vst [vmem:[#allocation4_spill] sm:$0xff] %v5005_v19  ;;  %vm210_vm2 = vcmp.eq.s32.totalorder %v5005_v19, 0  ;;  %vm251_vm3 = vcmp.eq.s32.totalorder %v5005_v19, 7 }
   0x5   :  { %110 = vrot.lane.b32.xlu1 %v4973_v8, %s4904_s17  ;;  %v4987_v13 = vmax.f32 %v48_v9, %v49_v10  ;;  %v52_v16 = vld [vmem:[%s6942_s0 + $0x50] sm:$0xff]  ;;  %v53_v17 = vld [vmem:[%s6942_s0 + $0x58] sm:$0xff]  ;;  %v5003_v18 = vmax.f32 %v50_v14, %v51_v15  ;;  %v54_v21 = vld [vmem:[%s6942_s0 + $0x60] sm:$0xff]  ;;  %38 = vst.msk [vmem:[#allocation3 + $0x50] sm:$0xff] %vm36_vm4, %v4903_v3 }
   0x6   :  { %v5009_v20 = vmax.f32 %v52_v16, %v53_v17  ;;  %v55_v22 = vld [vmem:[%s6942_s0 + $0x68] sm:$0xff]  ;;  %v58_v23 = vld [vmem:[%s6942_s0 + $0x80] sm:$0xff]  ;;  %v60_v31 = vld [vmem:[%s6942_s0 + $0x90] sm:$0xff]  ;;  %40 = vst.msk [vmem:[#allocation3 + $0x48] sm:$0xff] %vm36_vm4, %v4903_v3 }
   0x7   :  { %v59_v24 = vld [vmem:[%s6942_s0 + $0x88] sm:$0xff]  ;;  %v3810_v25 = vld [vmem:[%s6943_s1 + $0x4] sm:$0xf]  ;;  %v5028_v26 = vmax.f32 %v54_v21, %v55_v22  ;;  %v292_v29 = vld [vmem:[%s6943_s1] sm:$0xf]  ;;  %41 = vst.msk [vmem:[#allocation3 + $0x98] sm:$0xff] %vm36_vm4, %v4903_v3 }
   0x8   :  { %108 = vrot.lane.b32.xlu0 %v4983_v11, %s4904_s17  ;;  %4433 = vmatprep.subr.msk.mxu0 %vm343_vm1, %v3810_v25  ;;  %v5031_v27 = vld [vmem:[#allocation2] sm:$0xff]  ;;  %v5036_v28 = vld [vmem:[%s6943_s1 + $0x8] sm:$0xf]  ;;  %v5044_v30 = vmax.f32 %v58_v23, %v59_v24  ;;  %v61_v32 = vld [vmem:[%s6942_s0 + $0x98] sm:$0xff] }
   0x9   :  { %112 = vrot.lane.b32.xlu1 %v4987_v13, %s4904_s17  ;;  %4434 = vmatpush3.msk.msra.mxu0 %vm343_vm1, %v3810_v25  ;;  %v211_v33 = vrot.slane %v5031_v27, 7  ;;  %v62_v34 = vld [vmem:[%s6942_s0 + $0xa0] sm:$0xff]  ;;  %v63_v35 = vld [vmem:[%s6942_s0 + $0xa8] sm:$0xff]  ;;  %v5069_v37 = vmax.f32 %v60_v31, %v61_v32  ;;  %v64_v39 = vld [vmem:[%s6942_s0 + $0xb0] sm:$0xff] }
   0xa   :  { %4435 = vmatprep.mubr.msk.f32.mxu0 %vm30_vm0, %v5031_v27  ;;  %4485 = vmatprep.subr.msk.mxu0 %vm343_vm1, %v5036_v28  ;;  %v5074_v38 = vmax.f32 %v62_v34, %v63_v35  ;;  %v65_v40 = vld [vmem:[%s6942_s0 + $0xb8] sm:$0xff]  ;;  %v66_v41 = vld [vmem:[%s6942_s0 + $0xc0] sm:$0xff]  ;;  %v67_v42 = vld [vmem:[%s6942_s0 + $0xc8] sm:$0xff] }
   0xb   :  { %4459 = vmatprep.subr.msk.mxu1 %vm343_vm1, %v292_v29  ;;  %v231_v36 = vsel %vm210_vm2, 0.0, %v211_v33  ;;  %v5091_v43 = vmax.f32 %v64_v39, %v65_v40  ;;  %v5095_v44 = vmax.f32 %v66_v41, %v67_v42  ;;  %v68_v45 = vld [vmem:[%s6942_s0 + $0xd0] sm:$0xff]  ;;  %v69_v46 = vld [vmem:[%s6942_s0 + $0xd8] sm:$0xff]  ;;  %v70_v47 = vld [vmem:[%s6942_s0 + $0xe0] sm:$0xff] }
   0xc   :  { %114 = vrot.lane.b32.xlu0 %v5003_v18, %s4904_s17  ;;  %4460 = vmatpush3.msk.msra.mxu1 %vm343_vm1, %v292_v29  ;;  %v71_v48 = vld [vmem:[%s6942_s0 + $0xe8] sm:$0xff]  ;;  %v5111_v49 = vmax.f32 %v68_v45, %v69_v46  ;;  %v56_v51 = vld [vmem:[%s6942_s0 + $0x70] sm:$0xff]  ;;  %v57_v52 = vld [vmem:[%s6942_s0 + $0x78] sm:$0xff] }
   0xd   :  { %116 = vrot.lane.b32.xlu1 %v5009_v20, %s4904_s17  ;;  %4461 = vmatprep.mubr.msk.f32.mxu1 %vm30_vm0, %v231_v36  ;;  %v5115_v50 = vmax.f32 %v70_v47, %v71_v48  ;;  %v72_v53 = vld [vmem:[%s6942_s0 + $0xf0] sm:$0xff]  ;;  %v73_v54 = vld [vmem:[%s6942_s0 + $0xf8] sm:$0xff]  ;;  %v5131_v55 = vmax.f32 %v56_v51, %v57_v52  ;;  %v3863_v57 = vld [vmem:[%s6943_s1 + $0xc] sm:$0xf] }
   0xe   :  { %v5135_v56 = vmax.f32 %v72_v53, %v73_v54  ;;  %4511 = vmatprep.subr.msk.mxu1 %vm343_vm1, %v3863_v57  ;;  %v5182_v16 = vld [vmem:[%s6943_s1 + $0x14] sm:$0xf] }
   0xf   :  { %v5222_v32 = vld [vmem:[#allocation2 + $0x50] sm:$0xff] }
  0x10   :  { %118 = vrot.lane.b32.xlu0 %v5028_v26, %s4904_s17  ;;  %v221_v40 = vrot.slane %v5222_v32, 7 }
  0x11   :  { %122 = vrot.lane.b32.xlu1 %v5044_v30, %s4904_s17 }
  0x12   :  { %v241_v53 = vsel %vm210_vm2, 0.0, %v221_v40 }
  0x14   :  { %124 = vrot.lane.b32.xlu0 %v5069_v37, %s4904_s17 }
  0x15   :  { %126 = vrot.lane.b32.xlu1 %v5074_v38, %s4904_s17 }
  0x18   :  { %128 = vrot.lane.b32.xlu0 %v5091_v43, %s4904_s17 }
  0x19   :  { %130 = vrot.lane.b32.xlu1 %v5095_v44, %s4904_s17 }
  0x1c   :  { %132 = vrot.lane.b32.xlu0 %v5111_v49, %s4904_s17 }
  0x1d   :  { %134 = vrot.lane.b32.xlu1 %v5115_v50, %s4904_s17 }
  0x20   :  { %120 = vrot.lane.b32.xlu0 %v5131_v55, %s4904_s17 }
  0x21   :  { %136 = vrot.lane.b32.xlu1 %v5135_v56, %s4904_s17 }
  0x76   :  { %v107_v58 = vpop.permute.xlu0 %106 }
  0x77   :  { %v154_v59 = vmax.f32 %v4962_v4, %v107_v58  ;;  %v111_v60 = vpop.permute.xlu1 %110 }
  0x78   :  { %v156_v61 = vmax.f32 %v4973_v8, %v111_v60  ;;  %v5160_v8 = vld [vmem:[%s6943_s1 + $0x10] sm:$0xf] }
  0x79   :  { %172 = vst.msk [vmem:[#allocation2 + $0x8] sm:$0xff] %vm30_vm0, %v154_v59 }
  0x7a   :  { %174 = vst.msk [vmem:[#allocation2 + $0x18] sm:$0xff] %vm30_vm0, %v156_v61  ;;  %v109_v62 = vpop.permute.xlu0 %108 }
  0x7b   :  { %v155_v63 = vmax.f32 %v4983_v11, %v109_v62  ;;  %v113_v0 = vpop.permute.xlu1 %112 }
  0x7c   :  { %v157_v1 = vmax.f32 %v4987_v13, %v113_v0 }
  0x7d   :  { %173 = vst.msk [vmem:[#allocation2 + $0x10] sm:$0xff] %vm30_vm0, %v155_v63 }
  0x7e   :  { %175 = vst.msk [vmem:[#allocation2 + $0x20] sm:$0xff] %vm30_vm0, %v157_v1  ;;  %v115_v2 = vpop.permute.xlu0 %114 }
  0x7f   :  { %v158_v4 = vmax.f32 %v5003_v18, %v115_v2  ;;  %v117_v5 = vpop.permute.xlu1 %116 }
  0x80   :  { %v5154_v6 = vld [vmem:[#allocation2 + $0x8] sm:$0xff]  ;;  %v159_v7 = vmax.f32 %v5009_v20, %v117_v5 }
  0x81   :  { %176 = vst.msk [vmem:[#allocation2 + $0x28] sm:$0xff] %vm30_vm0, %v158_v4  ;;  %4436 = vmatmul.mubr.msk.f32.vlgmr.msra.gmra.mxu0 %vm30_vm0, %v5154_v6  ;;  %v212_v9 = vrot.slane %v5154_v6, 7  ;;  %v5166_v10 = vld [vmem:[#allocation2 + $0x18] sm:$0xff] }
  0x82   :  { %177 = vst.msk [vmem:[#allocation2 + $0x30] sm:$0xff] %vm30_vm0, %v159_v7  ;;  %4486 = vmatpush3.msk.msra.mxu0 %vm343_vm1, %v5036_v28  ;;  %v119_v11 = vpop.permute.xlu0 %118  ;;  %v214_v12 = vrot.slane %v5166_v10, 7  ;;  %v252_v7 = vrot.slane %v5031_v27, 1 }
  0x83   :  { %v160_v13 = vmax.f32 %v5028_v26, %v119_v11  ;;  %v5175_v14 = vsel %vm210_vm2, 0.0, %v212_v9  ;;  %v123_v15 = vpop.permute.xlu1 %122  ;;  %4537 = vmatprep.subr.msk.mxu0 %vm343_vm1, %v5160_v8 }
  0x84   :  { %4462 = vmatmul.mubr.msk.f32.vlgmr.msra.gmra.mxu1 %vm30_vm0, %v5175_v14  ;;  %v5186_v17 = vld [vmem:[#allocation2 + $0x10] sm:$0xff]  ;;  %v162_v18 = vmax.f32 %v5044_v30, %v123_v15  ;;  %v5201_v22 = vsel %vm210_vm2, 0.0, %v214_v12 }
  0x85   :  { %178 = vst.msk [vmem:[#allocation2 + $0x38] sm:$0xff] %vm30_vm0, %v160_v13  ;;  %4438 = vmatprep.mubr.msk.f32.mxu0 %vm30_vm0, %v5186_v17  ;;  %v213_v20 = vrot.slane %v5186_v17, 7  ;;  %v5193_v21 = vld [vmem:[#allocation2 + $0x20] sm:$0xff]  ;;  %4512 = vmatpush3.msk.msra.mxu1 %vm343_vm1, %v3863_v57 }
  0x86   :  { %4439 = vmatmul.mubr.msk.f32.gmra.mxu0 %vm30_vm0, %v5166_v10  ;;  %180 = vst.msk [vmem:[#allocation2 + $0x58] sm:$0xff] %vm30_vm0, %v162_v18  ;;  %v125_v23 = vpop.permute.xlu0 %124  ;;  %v215_v24 = vrot.slane %v5193_v21, 7  ;;  %4563 = vmatprep.subr.msk.mxu1 %vm343_vm1, %v5182_v16  ;;  %v272_v18 = vsel %vm251_vm3, 0.0, %v252_v7 }
  0x87   :  { %v5208_v25 = vsel %vm210_vm2, 0.0, %v213_v20  ;;  %4441 = vmatprep.mubr.msk.f32.mxu0 %vm30_vm0, %v5193_v21  ;;  %v163_v26 = vmax.f32 %v5069_v37, %v125_v23  ;;  %v127_v28 = vpop.permute.xlu1 %126  ;;  %v253_v20 = vrot.slane %v5154_v6, 1 }
  0x88   :  { %4464 = vmatprep.mubr.msk.f32.mxu1 %vm30_vm0, %v5208_v25  ;;  %v5215_v29 = vld [vmem:[#allocation2 + $0x28] sm:$0xff]  ;;  %v164_v30 = vmax.f32 %v5074_v38, %v127_v28  ;;  %v5220_v31 = vsel %vm210_vm2, 0.0, %v215_v24  ;;  %v254_v24 = vrot.slane %v5186_v17, 1  ;;  %v255_v28 = vrot.slane %v5166_v10, 1 }
  0x89   :  { %4465 = vmatmul.mubr.msk.f32.gmra.mxu1 %vm30_vm0, %v5201_v22  ;;  %181 = vst.msk [vmem:[#allocation2 + $0x60] sm:$0xff] %vm30_vm0, %v163_v26  ;;  %v5227_v33 = vld [vmem:[#allocation2 + $0x30] sm:$0xff]  ;;  %v216_v34 = vrot.slane %v5215_v29, 7  ;;  %v5365_v26 = vsel %vm251_vm3, 0.0, %v253_v20 }
  0x8a   :  { %4442 = vmatmul.mubr.msk.f32.gmra.mxu0 %vm30_vm0, %v5215_v29  ;;  %182 = vst.msk [vmem:[#allocation2 + $0x68] sm:$0xff] %vm30_vm0, %v164_v30  ;;  %4467 = vmatprep.mubr.msk.f32.mxu1 %vm30_vm0, %v5220_v31  ;;  %v129_v35 = vpop.permute.xlu0 %128  ;;  %v217_v36 = vrot.slane %v5227_v33, 7  ;;  %v5371_v30 = vld [vmem:[%s6943_s1 + $0x18] sm:$0xf] }
  0x8b   :  { %4444 = vmatprep.mubr.msk.f32.mxu0 %vm30_vm0, %v5227_v33  ;;  %v5240_v37 = vsel %vm210_vm2, 0.0, %v216_v34  ;;  %v165_v38 = vmax.f32 %v5091_v43, %v129_v35  ;;  %v131_v39 = vpop.permute.xlu1 %130  ;;  %v5379_v34 = vsel %vm251_vm3, 0.0, %v254_v24  ;;  %v256_v35 = vrot.slane %v5193_v21, 1 }
  0x8c   :  { %v5244_v41 = vld [vmem:[#allocation2 + $0x38] sm:$0xff]  ;;  %v166_v42 = vmax.f32 %v5095_v44, %v131_v39  ;;  %v5249_v45 = vsel %vm210_vm2, 0.0, %v217_v36  ;;  %v257_v36 = vrot.slane %v5215_v29, 1  ;;  %v258_v39 = vrot.slane %v5227_v33, 1 }
  0x8d   :  { %4468 = vmatmul.mubr.msk.f32.gmra.mxu1 %vm30_vm0, %v5240_v37  ;;  %183 = vst.msk [vmem:[#allocation2 + $0x70] sm:$0xff] %vm30_vm0, %v165_v38  ;;  %v218_v46 = vrot.slane %v5244_v41, 7  ;;  %v5255_v47 = vld [vmem:[#allocation2 + $0x58] sm:$0xff] }
  0x8e   :  { %4445 = vmatmul.mubr.msk.f32.gmra.mxu0 %vm30_vm0, %v5244_v41  ;;  %184 = vst.msk [vmem:[#allocation2 + $0x78] sm:$0xff] %vm30_vm0, %v166_v42  ;;  %4470 = vmatprep.mubr.msk.f32.mxu1 %vm30_vm0, %v5249_v45  ;;  %v133_v43 = vpop.permute.xlu0 %132  ;;  %v222_v44 = vrot.slane %v5255_v47, 7  ;;  %v5398_v38 = vld [vmem:[%s6943_s1 + $0x1c] sm:$0xf]  ;;  %v262_v42 = vrot.slane %v5222_v32, 1 }
  0x8f   :  { %4447 = vmatprep.mubr.msk.f32.mxu0 %vm30_vm0, %v5222_v32  ;;  %v5267_v48 = vsel %vm210_vm2, 0.0, %v218_v46  ;;  %v167_v51 = vmax.f32 %v5111_v49, %v133_v43  ;;  %v135_v52 = vpop.permute.xlu1 %134  ;;  %v5422_v46 = vsel %vm251_vm3, 0.0, %v257_v36  ;;  %v259_v43 = vrot.slane %v5244_v41, 1 }
  0x90   :  { %v168_v54 = vmax.f32 %v5115_v50, %v135_v52  ;;  %v5273_v57 = vld [vmem:[#allocation2 + $0x60] sm:$0xff]  ;;  %v5287_v49 = vsel %vm210_vm2, 0.0, %v222_v44  ;;  %v282_v44 = vsel %vm251_vm3, 0.0, %v262_v42  ;;  %v263_v52 = vrot.slane %v5255_v47, 1 }
  0x91   :  { %4471 = vmatmul.mubr.msk.f32.gmra.mxu1 %vm30_vm0, %v5267_v48  ;;  %185 = vst.msk [vmem:[#allocation2 + $0x80] sm:$0xff] %vm30_vm0, %v167_v51  ;;  %v5278_v58 = vld [vmem:[#allocation2 + $0x68] sm:$0xff]  ;;  %v223_v59 = vrot.slane %v5273_v57, 7  ;;  %v5442_v51 = vsel %vm251_vm3, 0.0, %v259_v43 }
  0x92   :  { %4448 = vmatmul.mubr.msk.f32.gmra.mxu0 %vm30_vm0, %v5255_v47  ;;  %186 = vst.msk [vmem:[#allocation2 + $0x88] sm:$0xff] %vm30_vm0, %v168_v54  ;;  %4473 = vmatprep.mubr.msk.f32.mxu1 %vm30_vm0, %v241_v53  ;;  %v224_v50 = vrot.slane %v5278_v58, 7  ;;  %v121_v60 = vpop.permute.xlu0 %120  ;;  %v264_v54 = vrot.slane %v5273_v57, 1 }
  0x93   :  { %4450 = vmatprep.mubr.msk.f32.mxu0 %vm30_vm0, %v5273_v57  ;;  %v5294_v61 = vsel %vm210_vm2, 0.0, %v223_v59  ;;  %v161_v62 = vmax.f32 %v5131_v55, %v121_v60  ;;  %v137_v63 = vpop.permute.xlu1 %136  ;;  %v283_v59 = vsel %vm251_vm3, 0.0, %v263_v52 }
  0x94   :  { %v5297_v0 = vld [vmem:[#allocation2 + $0x70] sm:$0xff]  ;;  %v169_v1 = vmax.f32 %v5135_v56, %v137_v63  ;;  %v5312_v55 = vsel %vm210_vm2, 0.0, %v224_v50  ;;  %v265_v50 = vrot.slane %v5278_v58, 1  ;;  %v5465_v60 = vsel %vm251_vm3, 0.0, %v264_v54 }
  0x95   :  { %4474 = vmatmul.mubr.msk.f32.gmra.mxu1 %vm30_vm0, %v5287_v49  ;;  %v5302_v2 = vld [vmem:[#allocation2 + $0x78] sm:$0xff]  ;;  %v225_v4 = vrot.slane %v5297_v0, 7  ;;  %179 = vst.msk [vmem:[#allocation2 + $0x40] sm:$0xff] %vm30_vm0, %v161_v62  ;;  %v266_v62 = vrot.slane %v5297_v0, 1 }
  0x96   :  { %4451 = vmatmul.mubr.msk.f32.gmra.mxu0 %vm30_vm0, %v5278_v58  ;;  %4476 = vmatprep.mubr.msk.f32.mxu1 %vm30_vm0, %v5294_v61  ;;  %v226_v56 = vrot.slane %v5302_v2, 7  ;;  %187 = vst.msk [vmem:[#allocation2 + $0x90] sm:$0xff] %vm30_vm0, %v169_v1  ;;  %v5474_v63 = vsel %vm251_vm3, 0.0, %v265_v50  ;;  %v267_v1 = vrot.slane %v5302_v2, 1 }
  0x97   :  { %4453 = vmatprep.mubr.msk.f32.mxu0 %vm30_vm0, %v5297_v0  ;;  %v5320_v5 = vsel %vm210_vm2, 0.0, %v225_v4 }
  0x98   :  { %v5323_v9 = vld [vmem:[#allocation2 + $0x80] sm:$0xff]  ;;  %v5336_v13 = vsel %vm210_vm2, 0.0, %v226_v56  ;;  %v5494_v7 = vsel %vm251_vm3, 0.0, %v267_v1  ;;  %v5751_v1 = vld [vmem:[%s6944_s4 + $0x10] sm:$0xff] }
  0x99   :  { %4477 = vmatmul.mubr.msk.f32.gmra.mxu1 %vm30_vm0, %v5312_v55  ;;  %v5327_v11 = vld [vmem:[#allocation2 + $0x88] sm:$0xff]  ;;  %v227_v12 = vrot.slane %v5323_v9, 7  ;;  %v268_v4 = vrot.slane %v5323_v9, 1  ;;  %6957 = vst [vmem:[#allocation6_spill] sm:$0xff] %v5751_v1 }
  0x9a   :  { %4454 = vmatmul.mubr.msk.f32.gmra.mxu0 %vm30_vm0, %v5302_v2  ;;  %4479 = vmatprep.mubr.msk.f32.mxu1 %vm30_vm0, %v5320_v5  ;;  %v228_v27 = vrot.slane %v5327_v11, 7 }
  0x9b   :  { %4456 = vmatprep.mubr.msk.f32.mxu0 %vm30_vm0, %v5323_v9  ;;  %v5343_v15 = vsel %vm210_vm2, 0.0, %v227_v12  ;;  %v269_v12 = vrot.slane %v5327_v11, 1 }
  0x9c   :  { %v5357_v23 = vsel %vm210_vm2, 0.0, %v228_v27  ;;  %v5411_v40 = vld [vmem:[#allocation2 + $0x40] sm:$0xff]  ;;  %v5503_v27 = vsel %vm251_vm3, 0.0, %v268_v4 }
  0x9d   :  { %4480 = vmatmul.mubr.msk.f32.gmra.mxu1 %vm30_vm0, %v5336_v13  ;;  %v219_v32 = vrot.slane %v5411_v40, 7  ;;  %v5488_v56 = vld [vmem:[#allocation2 + $0x90] sm:$0xff]  ;;  %v5512_v20 = vsel %vm251_vm3, 0.0, %v269_v12 }
  0x9e   :  { %4457 = vmatmul.mubr.msk.f32.gmra.mxu0 %vm30_vm0, %v5327_v11  ;;  %4482 = vmatprep.mubr.msk.f32.mxu1 %vm30_vm0, %v5343_v15 }
  0x9f   :  { %4487 = vmatprep.mubr.msk.f32.mxu0 %vm30_vm0, %v272_v18  ;;  %v5451_v53 = vsel %vm210_vm2, 0.0, %v219_v32  ;;  %v229_v18 = vrot.slane %v5488_v56, 7 }
  0xa1   :  { %4483 = vmatmul.mubr.msk.f32.gmra.mxu1 %vm30_vm0, %v5357_v23  ;;  %v5520_v24 = vsel %vm210_vm2, 0.0, %v229_v18 }
  0xa2   :  { %4488 = vmatmul.mubr.msk.f32.vlgmr.msra.gmra.mxu0 %vm30_vm0, %v5365_v26  ;;  %4513 = vmatprep.mubr.msk.f32.mxu1 %vm30_vm0, %v5175_v14  ;;  %v5392_v14 = vsel %vm251_vm3, 0.0, %v255_v28  ;;  %v3953_v28 = vld [vmem:[%s6943_s1 + $0x20] sm:$0xf] }
  0xa3   :  { %4538 = vmatpush3.msk.msra.mxu0 %vm343_vm1, %v5160_v8  ;;  %4490 = vmatprep.mubr.msk.f32.mxu0 %vm30_vm0, %v5379_v34  ;;  %v5406_v8 = vsel %vm251_vm3, 0.0, %v256_v35  ;;  %v197_v35 = vld [vmem:[#allocation2 + $0x48] sm:$0xff] }
  0xa4   :  { %4589 = vmatprep.subr.msk.mxu0 %vm343_vm1, %v5371_v30 }
  0xa5   :  { %4514 = vmatmul.mubr.msk.f32.vlgmr.msra.gmra.mxu1 %vm30_vm0, %v5208_v25 }
  0xa6   :  { %4491 = vmatmul.mubr.msk.f32.gmra.mxu0 %vm30_vm0, %v5392_v14  ;;  %4516 = vmatprep.mubr.msk.f32.mxu1 %vm30_vm0, %v5201_v22 }
  0xa7   :  { %4493 = vmatprep.mubr.msk.f32.mxu0 %vm30_vm0, %v5406_v8  ;;  %4564 = vmatpush3.msk.msra.mxu1 %vm343_vm1, %v5182_v16  ;;  %v5431_v16 = vsel %vm251_vm3, 0.0, %v258_v39 }
  0xa8   :  { %4615 = vmatprep.subr.msk.mxu1 %vm343_vm1, %v5398_v38 }
  0xa9   :  { %4517 = vmatmul.mubr.msk.f32.gmra.mxu1 %vm30_vm0, %v5220_v31 }
  0xaa   :  { %4494 = vmatmul.mubr.msk.f32.gmra.mxu0 %vm30_vm0, %v5422_v46  ;;  %4519 = vmatprep.mubr.msk.f32.mxu1 %vm30_vm0, %v5240_v37 }
  0xab   :  { %4496 = vmatprep.mubr.msk.f32.mxu0 %vm30_vm0, %v5431_v16 }
  0xad   :  { %4520 = vmatmul.mubr.msk.f32.gmra.mxu1 %vm30_vm0, %v5249_v45 }
  0xae   :  { %4497 = vmatmul.mubr.msk.f32.gmra.mxu0 %vm30_vm0, %v5442_v51  ;;  %4522 = vmatprep.mubr.msk.f32.mxu1 %vm30_vm0, %v5267_v48 }
  0xaf   :  { %4499 = vmatprep.mubr.msk.f32.mxu0 %vm30_vm0, %v282_v44 }
  0xb1   :  { %4523 = vmatmul.mubr.msk.f32.gmra.mxu1 %vm30_vm0, %v5451_v53 }
  0xb2   :  { %4500 = vmatmul.mubr.msk.f32.gmra.mxu0 %vm30_vm0, %v283_v59  ;;  %4525 = vmatprep.mubr.msk.f32.mxu1 %vm30_vm0, %v5287_v49  ;;  %v5483_v49 = vsel %vm251_vm3, 0.0, %v266_v62 }
  0xb3   :  { %4502 = vmatprep.mubr.msk.f32.mxu0 %vm30_vm0, %v5465_v60 }
  0xb5   :  { %4526 = vmatmul.mubr.msk.f32.gmra.mxu1 %vm30_vm0, %v5294_v61 }
  0xb6   :  { %4503 = vmatmul.mubr.msk.f32.gmra.mxu0 %vm30_vm0, %v5474_v63  ;;  %4528 = vmatprep.mubr.msk.f32.mxu1 %vm30_vm0, %v5312_v55 }
  0xb7   :  { %4505 = vmatprep.mubr.msk.f32.mxu0 %vm30_vm0, %v5483_v49 }
  0xb9   :  { %4529 = vmatmul.mubr.msk.f32.gmra.mxu1 %vm30_vm0, %v5320_v5 }
  0xba   :  { %4506 = vmatmul.mubr.msk.f32.gmra.mxu0 %vm30_vm0, %v5494_v7  ;;  %4531 = vmatprep.mubr.msk.f32.mxu1 %vm30_vm0, %v5336_v13 }
  0xbb   :  { %4508 = vmatprep.mubr.msk.f32.mxu0 %vm30_vm0, %v5503_v27 }
  0xbd   :  { %4532 = vmatmul.mubr.msk.f32.gmra.mxu1 %vm30_vm0, %v5343_v15 }
  0xbe   :  { %4509 = vmatmul.mubr.msk.f32.gmra.mxu0 %vm30_vm0, %v5512_v20  ;;  %4534 = vmatprep.mubr.msk.f32.mxu1 %vm30_vm0, %v5357_v23 }
  0xbf   :  { %4539 = vmatprep.mubr.msk.f32.mxu0 %vm30_vm0, %v5154_v6  ;;  %v260_v6 = vrot.slane %v5411_v40, 1 }
  0xc1   :  { %4535 = vmatmul.mubr.msk.f32.gmra.mxu1 %vm30_vm0, %v5520_v24 }
  0xc2   :  { %4540 = vmatmul.mubr.msk.f32.vlgmr.msra.gmra.mxu0 %vm30_vm0, %v5186_v17  ;;  %4565 = vmatprep.mubr.msk.f32.mxu1 %vm30_vm0, %v5365_v26  ;;  %v5567_v26 = vsel %vm251_vm3, 0.0, %v260_v6 }
  0xc3   :  { %4590 = vmatpush3.msk.msra.mxu0 %vm343_vm1, %v5371_v30  ;;  %4542 = vmatprep.mubr.msk.f32.mxu0 %vm30_vm0, %v5166_v10 }
  0xc4   :  { %4641 = vmatprep.subr.msk.mxu0 %vm343_vm1, %v3953_v28 }
  0xc5   :  { %4566 = vmatmul.mubr.msk.f32.vlgmr.msra.gmra.mxu1 %vm30_vm0, %v5379_v34 }
  0xc6   :  { %4543 = vmatmul.mubr.msk.f32.gmra.mxu0 %vm30_vm0, %v5193_v21  ;;  %4568 = vmatprep.mubr.msk.f32.mxu1 %vm30_vm0, %v5392_v14 }
  0xc7   :  { %4545 = vmatprep.mubr.msk.f32.mxu0 %vm30_vm0, %v5215_v29  ;;  %4616 = vmatpush3.msk.msra.mxu1 %vm343_vm1, %v5398_v38 }
  0xc9   :  { %4569 = vmatmul.mubr.msk.f32.gmra.mxu1 %vm30_vm0, %v5406_v8 }
  0xca   :  { %4546 = vmatmul.mubr.msk.f32.gmra.mxu0 %vm30_vm0, %v5227_v33  ;;  %4571 = vmatprep.mubr.msk.f32.mxu1 %vm30_vm0, %v5422_v46 }
  0xcb   :  { %4548 = vmatprep.mubr.msk.f32.mxu0 %vm30_vm0, %v5244_v41 }
  0xcd   :  { %4572 = vmatmul.mubr.msk.f32.gmra.mxu1 %vm30_vm0, %v5431_v16 }
  0xce   :  { %4549 = vmatmul.mubr.msk.f32.gmra.mxu0 %vm30_vm0, %v5411_v40  ;;  %4574 = vmatprep.mubr.msk.f32.mxu1 %vm30_vm0, %v5442_v51 }
  0xcf   :  { %4551 = vmatprep.mubr.msk.f32.mxu0 %vm30_vm0, %v5255_v47  ;;  %v270_v47 = vrot.slane %v5488_v56, 1 }
  0xd1   :  { %4575 = vmatmul.mubr.msk.f32.gmra.mxu1 %vm30_vm0, %v5567_v26  ;;  %v290_v30 = vsel %vm251_vm3, 0.0, %v270_v47 }
  0xd2   :  { %4552 = vmatmul.mubr.msk.f32.gmra.mxu0 %vm30_vm0, %v5273_v57  ;;  %4577 = vmatprep.mubr.msk.f32.mxu1 %vm30_vm0, %v283_v59 }
  0xd3   :  { %4554 = vmatprep.mubr.msk.f32.mxu0 %vm30_vm0, %v5278_v58 }
  0xd5   :  { %4578 = vmatmul.mubr.msk.f32.gmra.mxu1 %vm30_vm0, %v5465_v60 }
  0xd6   :  { %4555 = vmatmul.mubr.msk.f32.gmra.mxu0 %vm30_vm0, %v5297_v0  ;;  %4580 = vmatprep.mubr.msk.f32.mxu1 %vm30_vm0, %v5474_v63 }
  0xd7   :  { %4557 = vmatprep.mubr.msk.f32.mxu0 %vm30_vm0, %v5302_v2 }
  0xd9   :  { %4581 = vmatmul.mubr.msk.f32.gmra.mxu1 %vm30_vm0, %v5483_v49 }
  0xda   :  { %4558 = vmatmul.mubr.msk.f32.gmra.mxu0 %vm30_vm0, %v5323_v9  ;;  %4583 = vmatprep.mubr.msk.f32.mxu1 %vm30_vm0, %v5494_v7 }
  0xdb   :  { %4560 = vmatprep.mubr.msk.f32.mxu0 %vm30_vm0, %v5327_v11 }
  0xdd   :  { %4584 = vmatmul.mubr.msk.f32.gmra.mxu1 %vm30_vm0, %v5503_v27 }
  0xde   :  { %4561 = vmatmul.mubr.msk.f32.gmra.mxu0 %vm30_vm0, %v5488_v56  ;;  %4586 = vmatprep.mubr.msk.f32.mxu1 %vm30_vm0, %v5512_v20 }
  0xdf   :  { %4591 = vmatprep.mubr.msk.f32.mxu0 %vm30_vm0, %v5208_v25 }
  0xe1   :  { %4587 = vmatmul.mubr.msk.f32.gmra.mxu1 %vm30_vm0, %v290_v30 }
  0xe2   :  { %4592 = vmatmul.mubr.msk.f32.vlgmr.msra.gmra.mxu0 %vm30_vm0, %v5201_v22  ;;  %4617 = vmatprep.mubr.msk.f32.mxu1 %vm30_vm0, %v5186_v17  ;;  %v220_v22 = vrot.slane %v197_v35, 7  ;;  %v207_v17 = vld [vmem:[#allocation2 + $0x98] sm:$0xff] }
  0xe3   :  { %4642 = vmatpush3.msk.msra.mxu0 %vm343_vm1, %v3953_v28  ;;  %4594 = vmatprep.mubr.msk.f32.mxu0 %vm30_vm0, %v5220_v31 }
  0xe5   :  { %4618 = vmatmul.mubr.msk.f32.vlgmr.msra.gmra.mxu1 %vm30_vm0, %v5166_v10  ;;  %v240_v10 = vsel %vm210_vm2, 0.0, %v220_v22 }
  0xe6   :  { %4595 = vmatmul.mubr.msk.f32.gmra.mxu0 %vm30_vm0, %v5240_v37  ;;  %4620 = vmatprep.mubr.msk.f32.mxu1 %vm30_vm0, %v5193_v21  ;;  %v230_v21 = vrot.slane %v207_v17, 7 }
  0xe7   :  { %4597 = vmatprep.mubr.msk.f32.mxu0 %vm30_vm0, %v5249_v45 }
  0xe8   :  { %v250_v25 = vsel %vm210_vm2, 0.0, %v230_v21 }
  0xe9   :  { %4621 = vmatmul.mubr.msk.f32.gmra.mxu1 %vm30_vm0, %v5215_v29  ;;  %v261_v29 = vrot.slane %v197_v35, 1 }
  0xea   :  { %4598 = vmatmul.mubr.msk.f32.gmra.mxu0 %vm30_vm0, %v5267_v48  ;;  %4623 = vmatprep.mubr.msk.f32.mxu1 %vm30_vm0, %v5227_v33  ;;  %v271_v33 = vrot.slane %v207_v17, 1 }
  0xeb   :  { %4600 = vmatprep.mubr.msk.f32.mxu0 %vm30_vm0, %v5451_v53  ;;  %v281_v31 = vsel %vm251_vm3, 0.0, %v261_v29 }
  0xec   :  { %v291_v37 = vsel %vm251_vm3, 0.0, %v271_v33 }
  0xed   :  { %4624 = vmatmul.mubr.msk.f32.gmra.mxu1 %vm30_vm0, %v5244_v41  ;;  %v3973_v41 = vld [vmem:[%s6944_s4 + $0x8] sm:$0xff] }
  0xee   :  { %4601 = vmatmul.mubr.msk.f32.gmra.mxu0 %vm30_vm0, %v240_v10  ;;  %4626 = vmatprep.mubr.msk.f32.mxu1 %vm30_vm0, %v5411_v40  ;;  %v5727_v40 = vld [vmem:[#allocation3] sm:$0xff] }
  0xef   :  { %4603 = vmatprep.mubr.msk.f32.mxu0 %vm30_vm0, %v5294_v61  ;;  %4667 = vmatprep.subr.mxu1 %v3973_v41  ;;  %6956 = vst [vmem:[#allocation5_spill] sm:$0xff] %v5727_v40 }
  0xf0   :  { %4668 = vmatpush3.msra.mxu1 %v3973_v41 }
  0xf1   :  { %4627 = vmatmul.mubr.msk.f32.gmra.mxu1 %vm30_vm0, %v197_v35  ;;  %4719 = vmatprep.subr.mxu1 %v5751_v1 }
  0xf2   :  { %4604 = vmatmul.mubr.msk.f32.gmra.mxu0 %vm30_vm0, %v5312_v55  ;;  %4629 = vmatprep.mubr.msk.f32.mxu1 %vm30_vm0, %v5273_v57 }
  0xf3   :  { %4606 = vmatprep.mubr.msk.f32.mxu0 %vm30_vm0, %v5320_v5 }
  0xf5   :  { %4630 = vmatmul.mubr.msk.f32.gmra.mxu1 %vm30_vm0, %v5278_v58 }
  0xf6   :  { %4607 = vmatmul.mubr.msk.f32.gmra.mxu0 %vm30_vm0, %v5336_v13  ;;  %4632 = vmatprep.mubr.msk.f32.mxu1 %vm30_vm0, %v5297_v0 }
  0xf7   :  { %4609 = vmatprep.mubr.msk.f32.mxu0 %vm30_vm0, %v5343_v15 }
  0xf9   :  { %4633 = vmatmul.mubr.msk.f32.gmra.mxu1 %vm30_vm0, %v5302_v2 }
  0xfa   :  { %4610 = vmatmul.mubr.msk.f32.gmra.mxu0 %vm30_vm0, %v5357_v23  ;;  %4635 = vmatprep.mubr.msk.f32.mxu1 %vm30_vm0, %v5323_v9 }
  0xfb   :  { %4612 = vmatprep.mubr.msk.f32.mxu0 %vm30_vm0, %v5520_v24 }
  0xfd   :  { %4636 = vmatmul.mubr.msk.f32.gmra.mxu1 %vm30_vm0, %v5327_v11 }
  0xfe   :  { %4613 = vmatmul.mubr.msk.f32.gmra.mxu0 %vm30_vm0, %v250_v25  ;;  %4638 = vmatprep.mubr.msk.f32.mxu1 %vm30_vm0, %v5488_v56 }
  0xff   :  { %4643 = vmatprep.mubr.msk.f32.mxu0 %vm30_vm0, %v5379_v34 }
 0x101   :  { %4639 = vmatmul.mubr.msk.f32.gmra.mxu1 %vm30_vm0, %v207_v17 }
 0x102   :  { %4644 = vmatmul.mubr.msk.f32.vlgmr.msra.gmra.mxu0 %vm30_vm0, %v5392_v14  ;;  %4669 = vmatprep.mubr.msk.f32.mxu1 %vm36_vm4, %v5727_v40 }
 0x103   :  { %4646 = vmatprep.mubr.msk.f32.mxu0 %vm30_vm0, %v5406_v8 }
 0x106   :  { %4647 = vmatmul.mubr.msk.f32.gmra.mxu0 %vm30_vm0, %v5422_v46  ;;  %v2034_v46 = vrot.slane %v5727_v40, 7 }
 0x107   :  { %4649 = vmatprep.mubr.msk.f32.mxu0 %vm30_vm0, %v5431_v16  ;;  %v2114_v16 = vld [vmem:[%s6944_s4] sm:$0xff] }
 0x108   :  { %4693 = vmatprep.subr.mxu0 %v2114_v16 }
 0x109   :  { %4694 = vmatpush3.msra.mxu0 %v2114_v16 }
 0x10a   :  { %4650 = vmatmul.mubr.msk.f32.gmra.mxu0 %vm30_vm0, %v5442_v51  ;;  %v2054_v51 = vsel %vm210_vm2, 0.0, %v2034_v46 }
 0x10b   :  { %4652 = vmatprep.mubr.msk.f32.mxu0 %vm30_vm0, %v5567_v26 }
 0x10e   :  { %4653 = vmatmul.mubr.msk.f32.gmra.mxu0 %vm30_vm0, %v281_v31 }
 0x10f   :  { %4655 = vmatprep.mubr.msk.f32.mxu0 %vm30_vm0, %v5465_v60 }
 0x112   :  { %4656 = vmatmul.mubr.msk.f32.gmra.mxu0 %vm30_vm0, %v5474_v63 }
 0x113   :  { %4658 = vmatprep.mubr.msk.f32.mxu0 %vm30_vm0, %v5483_v49 }
 0x116   :  { %4659 = vmatmul.mubr.msk.f32.gmra.mxu0 %vm30_vm0, %v5494_v7 }
 0x117   :  { %4661 = vmatprep.mubr.msk.f32.mxu0 %vm30_vm0, %v5503_v27 }
 0x11a   :  { %4662 = vmatmul.mubr.msk.f32.gmra.mxu0 %vm30_vm0, %v5512_v20 }
 0x11b   :  { %4664 = vmatprep.mubr.msk.f32.mxu0 %vm30_vm0, %v290_v30 }
 0x11e   :  { %4665 = vmatmul.mubr.msk.f32.gmra.mxu0 %vm30_vm0, %v291_v37 }
 0x11f   :  { %4695 = vmatprep.mubr.msk.f32.mxu0 %vm36_vm4, %v2054_v51 }
 0x141   :  { %v4437_v45 = vpop.f32.mrf.mxu0 }
 0x143   :  { %v5703_v48 = vpop.f32.mrf.mxu0 }
 0x144   :  { %v4463_v57 = vpop.f32.mrf.mxu1 }
 0x145   :  { %v615_v58 = vadd.f32 %v4463_v57, %v4437_v45 }
 0x146   :  { %v4440_v61 = vpop.f32.mrf.mxu0  ;;  %v5713_v0 = vpop.f32.mrf.mxu1 }
 0x148   :  { %v5715_v2 = vpop.f32.mrf.mxu0 }
 0x149   :  { %v4466_v55 = vpop.f32.mrf.mxu1 }
 0x14a   :  { %v625_v5 = vadd.f32 %v4466_v55, %v4440_v61  ;;  %v4443_v9 = vpop.f32.mrf.mxu0 }
 0x14b   :  { %v5717_v11 = vpop.f32.mrf.mxu1 }
 0x14c   :  { %v5719_v13 = vpop.f32.mrf.mxu0 }
 0x14d   :  { %v4469_v15 = vpop.f32.mrf.mxu1 }
 0x14e   :  { %v635_v23 = vadd.f32 %v4469_v15, %v4443_v9  ;;  %v4446_v34 = vpop.f32.mrf.mxu0 }
 0x14f   :  { %v5721_v14 = vpop.f32.mrf.mxu1 }
 0x150   :  { %v5723_v3 = vpop.f32.mrf.mxu0 }
 0x151   :  { %v4472_v36 = vpop.f32.mrf.mxu1 }
 0x152   :  { %v645_v38 = vadd.f32 %v4472_v36, %v4446_v34  ;;  %v4449_v8 = vpop.f32.mrf.mxu0 }
 0x153   :  { %v5725_v39 = vpop.f32.mrf.mxu1 }
 0x154   :  { %v5729_v42 = vpop.f32.mrf.mxu0 }
 0x155   :  { %v4475_v43 = vpop.f32.mrf.mxu1 }
 0x156   :  { %v655_v32 = vadd.f32 %v4475_v43, %v4449_v8  ;;  %v4452_v44 = vpop.f32.mrf.mxu0 }
 0x157   :  { %v5739_v52 = vpop.f32.mrf.mxu1 }
 0x158   :  { %v5742_v53 = vpop.f32.mrf.mxu0 }
 0x159   :  { %v4478_v54 = vpop.f32.mrf.mxu1 }
 0x15a   :  { %v665_v59 = vadd.f32 %v4478_v54, %v4452_v44  ;;  %v4455_v50 = vpop.f32.mrf.mxu0 }
 0x15b   :  { %v5744_v60 = vpop.f32.mrf.mxu1 }
 0x15c   :  { %v5746_v62 = vpop.f32.mrf.mxu0 }
 0x15d   :  { %v4481_v63 = vpop.f32.mrf.mxu1 }
 0x15e   :  { %v675_v49 = vadd.f32 %v4481_v63, %v4455_v50  ;;  %v4458_v4 = vpop.f32.mrf.mxu0 }
 0x15f   :  { %v5754_v56 = vpop.f32.mrf.mxu1 }
 0x160   :  { %v5756_v7 = vpop.f32.mrf.mxu0 }
 0x161   :  { %v4484_v12 = vpop.f32.mrf.mxu1 }
 0x162   :  { %v685_v27 = vadd.f32 %v4484_v12, %v4458_v4  ;;  %v4489_v18 = vpop.f32.mrf.mxu0 }
 0x163   :  { %v5758_v20 = vadd.f32 %v4489_v18, %v615_v58  ;;  %v5760_v24 = vpop.f32.mrf.mxu1  ;;  %v5793_v58 = vld [vmem:[%s6944_s4 + $0x18] sm:$0xff] }
 0x164   :  { %v5762_v28 = vpop.f32.mrf.mxu0  ;;  %6958 = vst [vmem:[#allocation7_spill] sm:$0xff] %v5793_v58  ;;  %4745 = vmatprep.subr.mxu0 %v5793_v58 }
 0x165   :  { %v5764_v6 = vpop.f32.mrf.mxu1 }
 0x166   :  { %v4492_v26 = vpop.f32.mrf.mxu0 }
 0x167   :  { %v5766_v47 = vadd.f32 %v4492_v26, %v625_v5  ;;  %v5768_v30 = vpop.f32.mrf.mxu1 }
 0x168   :  { %v5770_v35 = vpop.f32.mrf.mxu0 }
 0x169   :  { %v5772_v22 = vpop.f32.mrf.mxu1 }
 0x16a   :  { %v4495_v10 = vpop.f32.mrf.mxu0 }
 0x16b   :  { %v5774_v17 = vadd.f32 %v4495_v10, %v635_v23  ;;  %v5776_v21 = vpop.f32.mrf.mxu1 }
 0x16c   :  { %v5778_v25 = vpop.f32.mrf.mxu0 }
 0x16d   :  { %v5780_v29 = vpop.f32.mrf.mxu1 }
 0x16e   :  { %v4498_v31 = vpop.f32.mrf.mxu0 }
 0x16f   :  { %v5782_v33 = vadd.f32 %v4498_v31, %v645_v38  ;;  %v5784_v37 = vpop.f32.mrf.mxu1 }
 0x170   :  { %v5786_v41 = vpop.f32.mrf.mxu0 }
 0x171   :  { %v5788_v45 = vpop.f32.mrf.mxu1 }
 0x172   :  { %v4501_v57 = vpop.f32.mrf.mxu0 }
 0x173   :  { %v5795_v61 = vadd.f32 %v4501_v57, %v655_v32  ;;  %v5797_v55 = vpop.f32.mrf.mxu1 }
 0x174   :  { %v5800_v5 = vpop.f32.mrf.mxu0 }
 0x175   :  { %v5802_v9 = vpop.f32.mrf.mxu1 }
 0x176   :  { %v4504_v15 = vpop.f32.mrf.mxu0 }
 0x177   :  { %v5804_v23 = vadd.f32 %v4504_v15, %v665_v59  ;;  %v5806_v34 = vpop.f32.mrf.mxu1 }
 0x178   :  { %v5808_v36 = vpop.f32.mrf.mxu0 }
 0x179   :  { %v5810_v38 = vpop.f32.mrf.mxu1 }
 0x17a   :  { %v4507_v8 = vpop.f32.mrf.mxu0 }
 0x17b   :  { %v5812_v46 = vadd.f32 %v4507_v8, %v675_v49  ;;  %v5814_v43 = vpop.f32.mrf.mxu1 }
 0x17c   :  { %v5816_v16 = vpop.f32.mrf.mxu0 }
 0x17d   :  { %6959 = vst [vmem:[#allocation8_spill] sm:$0xff] %v5812_v46  ;;  %v5818_v32 = vpop.f32.mrf.mxu1 }
 0x17e   :  { %6960 = vst [vmem:[#allocation9_spill] sm:$0xff] %v5818_v32  ;;  %v4510_v44 = vpop.f32.mrf.mxu0 }
 0x17f   :  { %v5820_v51 = vadd.f32 %v4510_v44, %v685_v27  ;;  %v5822_v54 = vpop.f32.mrf.mxu1 }
 0x180   :  { %6962 = vst [vmem:[#allocation11_spill] sm:$0xff] %v5822_v54  ;;  %v5824_v59 = vpop.f32.mrf.mxu0 }
 0x181   :  { %6961 = vst [vmem:[#allocation10_spill] sm:$0xff] %v5820_v51  ;;  %v5826_v50 = vpop.f32.mrf.mxu1 }
 0x182   :  { %6963 = vst [vmem:[#allocation12_spill] sm:$0xff] %v5826_v50  ;;  %v4541_v63 = vpop.f32.mrf.mxu0 }
 0x183   :  { %v5828_v4 = vpop.f32.mrf.mxu1 }
 0x184   :  { %6964 = vst [vmem:[#allocation13_spill] sm:$0xff] %v5828_v4  ;;  %v1151_v49 = vpop.f32.mrf.mxu0 }
 0x185   :  { %v5830_v12 = vpop.f32.mrf.mxu1 }
 0x186   :  { %v5832_v18 = vpop.f32.mrf.mxu0 }
 0x187   :  { %v5834_v26 = vpop.f32.mrf.mxu1 }
 0x188   :  { %v5836_v10 = vpop.f32.mrf.mxu0 }
 0x189   :  { %v5838_v27 = vpop.f32.mrf.mxu1 }
 0x18a   :  { %v5840_v31 = vpop.f32.mrf.mxu0 }
 0x18b   :  { %v5842_v57 = vpop.f32.mrf.mxu1 }
 0x18c   :  { %6965 = vst [vmem:[#allocation14_spill] sm:$0xff] %v5842_v57  ;;  %v5844_v15 = vpop.f32.mrf.mxu0 }
 0x18d   :  { %v5846_v8 = vpop.f32.mrf.mxu1 }
 0x18e   :  { %6966 = vst [vmem:[#allocation15_spill] sm:$0xff] %v5846_v8  ;;  %v5848_v44 = vpop.f32.mrf.mxu0 }
 0x18f   :  { %6967 = vst [vmem:[#allocation16_spill] sm:$0xff] %v5848_v44  ;;  %v5850_v40 = vpop.f32.mrf.mxu1 }
 0x190   :  { %6968 = vst [vmem:[#allocation17_spill] sm:$0xff] %v5850_v40  ;;  %v5852_v58 = vpop.f32.mrf.mxu0 }
 0x191   :  { %6969 = vst [vmem:[#allocation18_spill] sm:$0xff] %v5852_v58  ;;  %v5854_v19 = vpop.f32.mrf.mxu1 }
 0x192   :  { %6970 = vst [vmem:[#allocation19_spill] sm:$0xff] %v5854_v19  ;;  %v5856_v1 = vpop.f32.mrf.mxu0 }
 0x193   :  { %6971 = vst [vmem:[#allocation20_spill] sm:$0xff] %v5856_v1  ;;  %v5858_v4 = vpop.f32.mrf.mxu1 }
 0x194   :  { %6972 = vst [vmem:[#allocation21_spill] sm:$0xff] %v5858_v4  ;;  %v5860_v50 = vpop.f32.mrf.mxu0 }
 0x195   :  { %6973 = vst [vmem:[#allocation22_spill] sm:$0xff] %v5860_v50  ;;  %v5862_v51 = vpop.f32.mrf.mxu1 }
 0x196   :  { %6974 = vst [vmem:[#allocation23_spill] sm:$0xff] %v5862_v51  ;;  %v5864_v54 = vpop.f32.mrf.mxu0 }
 0x197   :  { %6975 = vst [vmem:[#allocation24_spill] sm:$0xff] %v5864_v54  ;;  %v5866_v32 = vpop.f32.mrf.mxu1 }
 0x198   :  { %6976 = vst [vmem:[#allocation25_spill] sm:$0xff] %v5866_v32  ;;  %v5868_v8 = vpop.f32.mrf.mxu0 }
 0x199   :  { %6977 = vst [vmem:[#allocation26_spill] sm:$0xff] %v5868_v8  ;;  %v5870_v46 = vpop.f32.mrf.mxu1 }
 0x19a   :  { %6978 = vst [vmem:[#allocation27_spill] sm:$0xff] %v5870_v46  ;;  %v5872_v40 = vpop.f32.mrf.mxu0 }
 0x19b   :  { %6979 = vst [vmem:[#allocation28_spill] sm:$0xff] %v5872_v40  ;;  %v5874_v58 = vpop.f32.mrf.mxu1 }
 0x19c   :  { %6980 = vst [vmem:[#allocation29_spill] sm:$0xff] %v5874_v58  ;;  %v5876_v19 = vpop.f32.mrf.mxu0 }
 0x19d   :  { %6981 = vst [vmem:[#allocation30_spill] sm:$0xff] %v5876_v19  ;;  %v5878_v1 = vpop.f32.mrf.mxu1 }
 0x19e   :  { %6982 = vst [vmem:[#allocation31_spill] sm:$0xff] %v5878_v1  ;;  %v5880_v4 = vpop.f32.mrf.mxu0 }
 0x19f   :  { %6983 = vst [vmem:[#allocation32_spill] sm:$0xff] %v5880_v4  ;;  %v5882_v50 = vpop.f32.mrf.mxu1 }
 0x1a0   :  { %6984 = vst [vmem:[#allocation33_spill] sm:$0xff] %v5882_v50  ;;  %v5884_v51 = vpop.f32.mrf.mxu0 }
 0x1a1   :  { %6985 = vst [vmem:[#allocation34_spill] sm:$0xff] %v5884_v51  ;;  %v5886_v54 = vpop.f32.mrf.mxu1 }
 0x1a2   :  { %6986 = vst [vmem:[#allocation35_spill] sm:$0xff] %v5886_v54  ;;  %v4593_v32 = vpop.f32.mrf.mxu0 }
 0x1a3   :  { %v5888_v8 = vpop.f32.mrf.mxu1 }
 0x1a4   :  { %6987 = vst [vmem:[#allocation36_spill] sm:$0xff] %v5888_v8  ;;  %v1495_v46 = vpop.f32.mrf.mxu0 }
 0x1a5   :  { %v5890_v44 = vpop.f32.mrf.mxu1 }
 0x1a6   :  { %v5892_v40 = vpop.f32.mrf.mxu0 }
 0x1a7   :  { %6988 = vst [vmem:[#allocation37_spill] sm:$0xff] %v5892_v40  ;;  %v5894_v58 = vpop.f32.mrf.mxu1  ;;  %v610_v40 = vadd.f32 %v5713_v0, %v5703_v48 }
 0x1a8   :  { %6989 = vst [vmem:[#allocation38_spill] sm:$0xff] %v5894_v58  ;;  %v5896_v19 = vpop.f32.mrf.mxu0 }
 0x1a9   :  { %6990 = vst [vmem:[#allocation39_spill] sm:$0xff] %v5896_v19  ;;  %v5898_v1 = vpop.f32.mrf.mxu1  ;;  %v886_v19 = vadd.f32 %v5762_v28, %v610_v40 }
 0x1aa   :  { %6991 = vst [vmem:[#allocation40_spill] sm:$0xff] %v5898_v1  ;;  %v5900_v4 = vpop.f32.mrf.mxu0 }
 0x1ab   :  { %6992 = vst [vmem:[#allocation41_spill] sm:$0xff] %v5900_v4  ;;  %v5902_v50 = vpop.f32.mrf.mxu1  ;;  %v1058_v48 = vadd.f32 %v5768_v30, %v886_v19  ;;  %v660_v19 = vadd.f32 %v5744_v60, %v5742_v53  ;;  %v680_v53 = vadd.f32 %v5760_v24, %v5756_v7  ;;  %v1063_v60 = vadd.f32 %v5780_v29, %v5774_v17 }
 0x1ac   :  { %6993 = vst [vmem:[#allocation42_spill] sm:$0xff] %v5902_v50  ;;  %v5904_v51 = vpop.f32.mrf.mxu0  ;;  %v620_v50 = vadd.f32 %v5717_v11, %v5715_v2  ;;  %v650_v2 = vadd.f32 %v5739_v52, %v5729_v42  ;;  %v1061_v11 = vadd.f32 %v5772_v22, %v5766_v47  ;;  %v670_v47 = vadd.f32 %v5754_v56, %v5746_v62 }
 0x1ad   :  { %v5908_v8 = vpop.f32.mrf.mxu1  ;;  %v1065_v62 = vadd.f32 %v5788_v45, %v5782_v33  ;;  %v1067_v7 = vadd.f32 %v5802_v9, %v5795_v61  ;;  %v1235_v24 = vadd.f32 %v5840_v31, %v1063_v60  ;;  %v1069_v33 = vadd.f32 %v5810_v38, %v5804_v23  ;;  %v7004_v23 = vld [vmem:[#allocation15_spill] sm:$0xff]  ;;  %v6012_v60 = vld [vmem:[%s6946_s3] ss:$0 sm:$0xff] }
 0x1ae   :  { %v5906_v54 = vpop.f32.mrf.mxu0  ;;  %6995 = vst [vmem:[#allocation44_spill] sm:$0xff] %v5908_v8  ;;  %v888_v0 = vadd.f32 %v5770_v35, %v620_v50  ;;  %v1233_v42 = vadd.f32 %v5832_v18, %v1061_v11  ;;  %v896_v35 = vadd.f32 %v5808_v36, %v660_v19  ;;  %v900_v61 = vadd.f32 %v5824_v59, %v680_v53  ;;  %v6999_v50 = vld [vmem:[#allocation14_spill] sm:$0xff]  ;;  %v7003_v18 = vld [vmem:[#allocation9_spill] sm:$0xff]  ;;  %v7006_v59 = vld [vmem:[#allocation20_spill] sm:$0xff] }
 0x1af   :  { %6994 = vst [vmem:[#allocation43_spill] sm:$0xff] %v5906_v54  ;;  %v5917_v1 = vpop.f32.mrf.mxu1  ;;  %v1059_v54 = vadd.f32 %v5764_v6, %v5758_v20  ;;  %v1407_v38 = vadd.f32 %v7004_v23, %v1235_v24  ;;  %v7011_v19 = vld [vmem:[#allocation12_spill] sm:$0xff]  ;;  %v7022_v23 = vld [vmem:[#allocation26_spill] sm:$0xff] }
 0x1b0   :  { %v5910_v57 = vpop.f32.mrf.mxu0  ;;  %v1405_v36 = vadd.f32 %v5838_v27, %v1233_v42  ;;  %v1068_v45 = vadd.f32 %v5814_v43, %v896_v35  ;;  %v7005_v43 = vld [vmem:[#allocation18_spill] sm:$0xff]  ;;  %v1239_v27 = vadd.f32 %v7006_v59, %v1067_v7  ;;  %v7017_v7 = vld [vmem:[#allocation21_spill] sm:$0xff] }
 0x1b1   :  { %6996 = vst [vmem:[#allocation45_spill] sm:$0xff] %v5910_v57  ;;  %v630_v57 = vadd.f32 %v5721_v14, %v5719_v13  ;;  %v1231_v40 = vadd.f32 %v4541_v63, %v1059_v54  ;;  %v5931_v28 = vpop.f32.mrf.mxu1  ;;  %v1230_v14 = vadd.f32 %v1151_v49, %v1058_v48  ;;  %v7000_v63 = vld [vmem:[#allocation16_spill] sm:$0xff] }
 0x1b2   :  { %v5914_v58 = vpop.f32.mrf.mxu0 }
 0x1b3   :  { %6997 = vst [vmem:[#allocation46_spill] sm:$0xff] %v5914_v58  ;;  %v890_v13 = vadd.f32 %v5778_v25, %v630_v57  ;;  %v1403_v30 = vadd.f32 %v5830_v12, %v1231_v40  ;;  %v5951_v52 = vpop.f32.mrf.mxu1  ;;  %v1402_v25 = vadd.f32 %v5834_v26, %v1230_v14  ;;  %v7002_v12 = vld [vmem:[#allocation8_spill] sm:$0xff]  ;;  %v7009_v40 = vld [vmem:[#allocation39_spill] sm:$0xff]  ;;  %v7010_v14 = vld [vmem:[#allocation10_spill] sm:$0xff] }
 0x1b4   :  { %v5919_v4 = vpop.f32.mrf.mxu0  ;;  %v1071_v26 = vadd.f32 %v7003_v18, %v7002_v12  ;;  %v5997_v57 = vld [vmem:[%s6945_s2] ss:$0 sm:$0xff] }
 0x1b5   :  { %6998 = vst [vmem:[#allocation47_spill] sm:$0xff] %v5919_v4  ;;  %v640_v4 = vadd.f32 %v5725_v39, %v5723_v3  ;;  %v1060_v3 = vadd.f32 %v5776_v21, %v888_v0  ;;  %v894_v39 = vadd.f32 %v5800_v5, %v650_v2  ;;  %v1062_v21 = vadd.f32 %v5784_v37, %v890_v13  ;;  %v7021_v12 = vld [vmem:[#allocation24_spill] sm:$0xff] }
 0x1b6   :  { %v5925_v8 = vpop.f32.mrf.mxu0  ;;  %v1575_v5 = vadd.f32 %v4593_v32, %v1403_v30  ;;  %v898_v37 = vadd.f32 %v5816_v16, %v670_v47  ;;  %v1574_v54 = vadd.f32 %v1495_v46, %v1402_v25  ;;  %v5976_v32 = vpop.f32.mrf.mxu1  ;;  %v1237_v16 = vadd.f32 %v7000_v63, %v1065_v62  ;;  %v7001_v46 = vld [vmem:[#allocation37_spill] sm:$0xff] }
 0x1b7   :  { %v892_v20 = vadd.f32 %v5786_v41, %v640_v4  ;;  %v1232_v41 = vadd.f32 %v5836_v10, %v1060_v3  ;;  %v1066_v29 = vadd.f32 %v5806_v34, %v894_v39  ;;  %v1577_v49 = vadd.f32 %v7001_v46, %v1405_v36  ;;  %v7012_v3 = vld [vmem:[#allocation13_spill] sm:$0xff] }
 0x1b8   :  { %v5935_v58 = vpop.f32.mrf.mxu0  ;;  %v1747_v4 = vadd.f32 %v5890_v44, %v1575_v5  ;;  %v7008_v44 = vld [vmem:[#allocation38_spill] sm:$0xff]  ;;  %v6002_v11 = vpop.f32.mrf.mxu1  ;;  %v1072_v39 = vadd.f32 %v7012_v3, %v900_v61  ;;  %v7013_v30 = vld [vmem:[#allocation17_spill] sm:$0xff]  ;;  %v1241_v18 = vadd.f32 %v7021_v12, %v1069_v33 }
 0x1b9   :  { %v1064_v56 = vadd.f32 %v5797_v55, %v892_v20  ;;  %v1234_v55 = vadd.f32 %v5844_v15, %v1062_v21  ;;  %v1404_v34 = vadd.f32 %v6999_v50, %v1232_v41  ;;  %v7007_v15 = vld [vmem:[#allocation11_spill] sm:$0xff]  ;;  %v1746_v0 = vadd.f32 %v7008_v44, %v1574_v54  ;;  %v7014_v47 = vld [vmem:[#allocation41_spill] sm:$0xff]  ;;  %v7016_v41 = vld [vmem:[#allocation40_spill] sm:$0xff] }
 0x1ba   :  { %v5945_v6 = vpop.f32.mrf.mxu0  ;;  %v1070_v48 = vadd.f32 %v7007_v15, %v898_v37  ;;  %v1073_v20 = vadd.f32 %v7011_v19, %v7010_v14  ;;  %v1579_v53 = vadd.f32 %v7014_v47, %v1407_v38  ;;  %v7015_v21 = vld [vmem:[#allocation19_spill] sm:$0xff]  ;;  %v1749_v5 = vadd.f32 %v7016_v41, %v1577_v49  ;;  %v7018_v37 = vld [vmem:[#allocation22_spill] sm:$0xff]  ;;  %v7027_v33 = vld [vmem:[#allocation45_spill] sm:$0xff] }
 0x1bb   :  { %v1236_v10 = vadd.f32 %v7005_v43, %v1064_v56  ;;  %v1576_v2 = vadd.f32 %v7009_v40, %v1404_v34  ;;  %v1406_v42 = vadd.f32 %v7013_v30, %v1234_v55  ;;  %v1409_v25 = vadd.f32 %v7015_v21, %v1237_v16  ;;  %v7019_v54 = vld [vmem:[#allocation23_spill] sm:$0xff]  ;;  %v7020_v34 = vld [vmem:[#allocation42_spill] sm:$0xff]  ;;  %v7023_v43 = vld [vmem:[#allocation44_spill] sm:$0xff] }
 0x1bc   :  { %v5960_v22 = vpop.f32.mrf.mxu0  ;;  %v1238_v36 = vadd.f32 %v7018_v37, %v1066_v29  ;;  %v1411_v61 = vadd.f32 %v7019_v54, %v1239_v27  ;;  %v1240_v38 = vadd.f32 %v7022_v23, %v1068_v45  ;;  %v1751_v29 = vadd.f32 %v7023_v43, %v1579_v53  ;;  %v7034_v23 = vld [vmem:[#allocation32_spill] sm:$0xff]  ;;  %v7035_v43 = vld [vmem:[#allocation34_spill] sm:$0xff] }
 0x1bd   :  { %v1408_v24 = vadd.f32 %v7017_v7, %v1236_v10  ;;  %v1578_v55 = vadd.f32 %v5904_v51, %v1406_v42  ;;  %v1748_v63 = vadd.f32 %v7020_v34, %v1576_v2  ;;  %v7024_v10 = vld [vmem:[#allocation43_spill] sm:$0xff]  ;;  %v7026_v2 = vld [vmem:[#allocation28_spill] sm:$0xff] }
 0x1be   :  { %v5971_v17 = vpop.f32.mrf.mxu0  ;;  %v1581_v59 = vadd.f32 %v7024_v10, %v1409_v25  ;;  %v7029_v25 = vld [vmem:[#allocation29_spill] sm:$0xff] }
 0x1bf   :  { %v1750_v14 = vadd.f32 %v5917_v1, %v1578_v55  ;;  %v1580_v19 = vadd.f32 %v7027_v33, %v1408_v24  ;;  %v1412_v41 = vadd.f32 %v7029_v25, %v1240_v38  ;;  %v7032_v55 = vld [vmem:[#allocation31_spill] sm:$0xff]  ;;  %v1245_v38 = vadd.f32 %v7034_v23, %v1073_v20 }
 0x1c0   :  { %v5983_v9 = vpop.f32.mrf.mxu0 }
 0x1c1   :  { %v1752_v34 = vadd.f32 %v5951_v52, %v1580_v19  ;;  %v1584_v20 = vadd.f32 %v5935_v58, %v1412_v41  ;;  %v7037_v19 = vld [vmem:[#allocation35_spill] sm:$0xff] }
 0x1c2   :  { %v4645_v31 = vpop.f32.mrf.mxu0 }
 0x1c3   :  { %v1919_v13 = vadd.f32 %v4645_v31, %v1747_v4  ;;  %v6022_v4 = vpop.f32.mrf.mxu1 }
 0x1c4   :  { %v1839_v35 = vpop.f32.mrf.mxu0 }
 0x1c5   :  { %v1942_v62 = vmul.f32 %v5997_v57, %v1919_v13  ;;  %v1918_v56 = vadd.f32 %v1839_v35, %v1746_v0  ;;  %v7025_v0 = vld [vmem:[#allocation25_spill] sm:$0xff]  ;;  %v1243_v13 = vadd.f32 %v7026_v2, %v1071_v26  ;;  %v1717_v3 = vpop.f32.mrf.mxu1  ;;  %v7028_v35 = vld [vmem:[#allocation27_spill] sm:$0xff]  ;;  %v1753_v26 = vadd.f32 %v5931_v28, %v1581_v59 }
 0x1c6   :  { %v4648_v50 = vpop.f32.mrf.mxu0  ;;  %v1410_v40 = vadd.f32 %v7025_v0, %v1238_v36  ;;  %v1413_v21 = vadd.f32 %v7028_v35, %v1241_v18  ;;  %v7031_v36 = vld [vmem:[#allocation30_spill] sm:$0xff] }
 0x1c7   :  { %v1965_v16 = vadd.f32 %v6012_v60, %v1942_v62  ;;  %v1941_v46 = vmul.f32 %v5997_v57, %v1918_v56  ;;  %v1921_v49 = vadd.f32 %v4648_v50, %v1749_v5  ;;  %v7030_v5 = vld [vmem:[#allocation46_spill] sm:$0xff]  ;;  %v1242_v54 = vadd.f32 %v7031_v36, %v1070_v48 }
 0x1c8   :  { %v1849_v27 = vpop.f32.mrf.mxu0  ;;  %v1583_v1 = vadd.f32 %v7030_v5, %v1411_v61  ;;  %v1415_v50 = vadd.f32 %v7032_v55, %v1243_v13  ;;  %v1244_v48 = vadd.f32 %v7035_v43, %v1072_v39  ;;  %v1585_v52 = vadd.f32 %v5925_v8, %v1413_v21 }
 0x1c9   :  { %v1981_v51 = vmax.f32 %v1965_v16, 0.0  ;;  %v1964_v31 = vadd.f32 %v6012_v60, %v1941_v46  ;;  %v1944_v15 = vmul.f32 %v5997_v57, %v1921_v49  ;;  %v1920_v44 = vadd.f32 %v1849_v27, %v1748_v63  ;;  %v7033_v63 = vld [vmem:[#allocation47_spill] sm:$0xff]  ;;  %v4637_v46 = vpop.f32.mrf.mxu1 }
 0x1ca   :  { %v4651_v45 = vpop.f32.mrf.mxu0  ;;  %v1582_v16 = vadd.f32 %v7033_v63, %v1410_v40  ;;  %v1587_v39 = vadd.f32 %v5945_v6, %v1415_v50  ;;  %v1757_v58 = vadd.f32 %v6022_v4, %v1585_v52  ;;  %v1756_v4 = vadd.f32 %v1717_v3, %v1584_v20 }
 0x1cb   :  { %1999 = vst.msk [vmem:[#allocation3 + $0x10] sm:$0xff] %vm36_vm4, %v1981_v51  ;;  %v1980_v30 = vmax.f32 %v1964_v31, 0.0  ;;  %v1967_v42 = vadd.f32 %v6012_v60, %v1944_v15  ;;  %v1943_v47 = vmul.f32 %v5997_v57, %v1920_v44  ;;  %v1923_v53 = vadd.f32 %v4651_v45, %v1751_v29  ;;  %v7036_v15 = vld [vmem:[#allocation33_spill] sm:$0xff]  ;;  %v1727_v8 = vpop.f32.mrf.mxu1 }
 0x1cc   :  { %v1859_v62 = vpop.f32.mrf.mxu0  ;;  %v1755_v29 = vadd.f32 %v5976_v32, %v1583_v1  ;;  %v1414_v44 = vadd.f32 %v7036_v15, %v1242_v54  ;;  %v1754_v0 = vadd.f32 %v6002_v11, %v1582_v16  ;;  %v1417_v45 = vadd.f32 %v7037_v19, %v1245_v38  ;;  %v7039_v1 = vld [vmem:[#allocation6_spill] sm:$0xff] }
 0x1cd   :  { %1998 = vst.msk [vmem:[#allocation3 + $0x8] sm:$0xff] %vm36_vm4, %v1980_v30  ;;  %v1983_v56 = vmax.f32 %v1967_v42, 0.0  ;;  %v1966_v7 = vadd.f32 %v6012_v60, %v1943_v47  ;;  %v1946_v24 = vmul.f32 %v5997_v57, %v1923_v53  ;;  %v1922_v37 = vadd.f32 %v1859_v62, %v1750_v14  ;;  %v7038_v30 = vld [vmem:[#allocation36_spill] sm:$0xff] }
 0x1ce   :  { %v4654_v28 = vpop.f32.mrf.mxu0  ;;  %v1416_v11 = vadd.f32 %v7038_v30, %v1244_v48  ;;  %v6078_v53 = vld [vmem:[%s6944_s4 + $0x20] sm:$0xff]  ;;  %v1759_v5 = vadd.f32 %v4637_v46, %v1587_v39  ;;  %v1589_v54 = vadd.f32 %v5971_v17, %v1417_v45 }
 0x1cf   :  { %2001 = vst.msk [vmem:[#allocation3 + $0x20] sm:$0xff] %vm36_vm4, %v1983_v56  ;;  %v1982_v61 = vmax.f32 %v1966_v7, 0.0  ;;  %v1969_v49 = vadd.f32 %v6012_v60, %v1946_v24  ;;  %v1945_v12 = vmul.f32 %v5997_v57, %v1922_v37  ;;  %v1925_v18 = vadd.f32 %v4654_v28, %v1753_v26  ;;  %v4640_v24 = vpop.f32.mrf.mxu1 }
 0x1d0   :  { %v1869_v10 = vpop.f32.mrf.mxu0  ;;  %v1586_v26 = vadd.f32 %v5960_v22, %v1414_v44  ;;  %v1588_v23 = vadd.f32 %v5983_v9, %v1416_v11 }
 0x1d1   :  { %2000 = vst.msk [vmem:[#allocation3 + $0x18] sm:$0xff] %vm36_vm4, %v1982_v61  ;;  %v1985_v59 = vmax.f32 %v1969_v49, 0.0  ;;  %v1968_v27 = vadd.f32 %v6012_v60, %v1945_v12  ;;  %v1948_v51 = vmul.f32 %v5997_v57, %v1925_v18  ;;  %v1924_v31 = vadd.f32 %v1869_v10, %v1752_v34  ;;  %v6118_v12 = vld [vmem:[%s6944_s4 + $0x28] sm:$0xff] }
 0x1d2   :  { %v4657_v32 = vpop.f32.mrf.mxu0  ;;  %v6064_v40 = vld [vmem:[#allocation3 + $0x10] sm:$0xff]  ;;  %v1758_v18 = vadd.f32 %v1727_v8, %v1586_v26 }
 0x1d3   :  { %2003 = vst.msk [vmem:[#allocation3 + $0x30] sm:$0xff] %vm36_vm4, %v1985_v59  ;;  %v1984_v2 = vmax.f32 %v1968_v27, 0.0  ;;  %v1971_v13 = vadd.f32 %v6012_v60, %v1948_v51  ;;  %v1947_v14 = vmul.f32 %v5997_v57, %v1924_v31  ;;  %v1927_v33 = vadd.f32 %v4657_v32, %v1755_v29  ;;  %v1737_v29 = vpop.f32.mrf.mxu1  ;;  %v6131_v27 = vld [vmem:[#allocation3 + $0x50] sm:$0xff]  ;;  %v7041_v51 = vld [vmem:[#allocation7_spill] sm:$0xff] }
 0x1d4   :  { %v1879_v42 = vpop.f32.mrf.mxu0  ;;  %v6072_v6 = vld [vmem:[#allocation3 + $0x8] sm:$0xff]  ;;  %v2036_v47 = vrot.slane %v6064_v40, 7  ;;  %v1761_v31 = vadd.f32 %v4640_v24, %v1589_v54  ;;  %v2044_v45 = vrot.slane %v6131_v27, 7 }
 0x1d5   :  { %2002 = vst.msk [vmem:[#allocation3 + $0x28] sm:$0xff] %vm36_vm4, %v1984_v2  ;;  %v1987_v35 = vmax.f32 %v1971_v13, 0.0  ;;  %v1970_v21 = vadd.f32 %v6012_v60, %v1947_v14  ;;  %v1950_v25 = vmul.f32 %v5997_v57, %v1927_v33  ;;  %v1926_v41 = vadd.f32 %v1879_v42, %v1754_v0  ;;  %4670 = vmatmul.mubr.msk.f32.vlgmr.msra.gmra.mxu1 %vm36_vm4, %v6072_v6 }
 0x1d6   :  { %4720 = vmatpush3.msra.mxu1 %v7039_v1  ;;  %v4660_v62 = vpop.f32.mrf.mxu0  ;;  %4672 = vmatprep.mubr.msk.f32.mxu1 %vm36_vm4, %v6064_v40  ;;  %v2035_v56 = vrot.slane %v6072_v6, 7  ;;  %v6090_v7 = vld [vmem:[#allocation3 + $0x20] sm:$0xff]  ;;  %v6105_v16 = vsel %vm210_vm2, 0.0, %v2036_v47  ;;  %v1760_v14 = vadd.f32 %v1737_v29, %v1588_v23  ;;  %v7042_v29 = vld [vmem:[#allocation5_spill] sm:$0xff] }
 0x1d7   :  { %2005 = vst.msk [vmem:[#allocation3 + $0x40] sm:$0xff] %vm36_vm4, %v1987_v35  ;;  %v1986_v37 = vmax.f32 %v1970_v21, 0.0  ;;  %v1973_v36 = vadd.f32 %v6012_v60, %v1950_v25  ;;  %v1949_v3 = vmul.f32 %v5997_v57, %v1926_v41  ;;  %v1929_v22 = vadd.f32 %v4660_v62, %v1757_v58  ;;  %4771 = vmatprep.subr.mxu1 %v6078_v53 }
 0x1d8   :  { %v1889_v55 = vpop.f32.mrf.mxu0  ;;  %v6099_v34 = vsel %vm210_vm2, 0.0, %v2035_v56  ;;  %v6101_v63 = vld [vmem:[#allocation3 + $0x18] sm:$0xff]  ;;  %v2038_v28 = vrot.slane %v6090_v7, 7 }
 0x1d9   :  { %2004 = vst.msk [vmem:[#allocation3 + $0x38] sm:$0xff] %vm36_vm4, %v1986_v37  ;;  %v1989_v46 = vmax.f32 %v1973_v36, 0.0  ;;  %v1972_v61 = vadd.f32 %v6012_v60, %v1949_v3  ;;  %v1952_v17 = vmul.f32 %v5997_v57, %v1929_v22  ;;  %v1928_v49 = vadd.f32 %v1889_v55, %v1756_v4  ;;  %4696 = vmatmul.mubr.msk.f32.vlgmr.msra.gmra.mxu0 %vm36_vm4, %v6099_v34 }
 0x1da   :  { %4673 = vmatmul.mubr.msk.f32.gmra.mxu1 %vm36_vm4, %v6101_v63  ;;  %4698 = vmatprep.mubr.msk.f32.mxu0 %vm36_vm4, %v6105_v16  ;;  %v4663_v38 = vpop.f32.mrf.mxu0  ;;  %v2037_v43 = vrot.slane %v6101_v63, 7  ;;  %v6126_v48 = vld [vmem:[#allocation3 + $0x30] sm:$0xff]  ;;  %v6142_v20 = vsel %vm210_vm2, 0.0, %v2038_v28  ;;  %v2064_v36 = vsel %vm210_vm2, 0.0, %v2044_v45 }
 0x1db   :  { %4675 = vmatprep.mubr.msk.f32.mxu1 %vm36_vm4, %v6090_v7  ;;  %2007 = vst.msk [vmem:[#allocation3 + $0x60] sm:$0xff] %vm36_vm4, %v1989_v46  ;;  %v1988_v52 = vmax.f32 %v1972_v61, 0.0  ;;  %v1975_v10 = vadd.f32 %v6012_v60, %v1952_v17  ;;  %v1951_v59 = vmul.f32 %v5997_v57, %v1928_v49  ;;  %v1931_v9 = vadd.f32 %v4663_v38, %v1759_v5  ;;  %v6289_v45 = vld [vmem:[%s6944_s4 + $0x30] sm:$0xff] }
 0x1dc   :  { %4746 = vmatpush3.msra.mxu0 %v7041_v51  ;;  %v1899_v15 = vpop.f32.mrf.mxu0  ;;  %v6136_v44 = vsel %vm210_vm2, 0.0, %v2037_v43  ;;  %v6138_v0 = vld [vmem:[#allocation3 + $0x28] sm:$0xff]  ;;  %v2040_v39 = vrot.slane %v6126_v48, 7 }
 0x1dd   :  { %4797 = vmatprep.subr.mxu0 %v6118_v12  ;;  %2006 = vst.msk [vmem:[#allocation3 + $0x58] sm:$0xff] %vm36_vm4, %v1988_v52  ;;  %v1991_v32 = vmax.f32 %v1975_v10, 0.0  ;;  %v1974_v8 = vadd.f32 %v6012_v60, %v1951_v59  ;;  %v1954_v2 = vmul.f32 %v5997_v57, %v1931_v9  ;;  %v1930_v13 = vadd.f32 %v1899_v15, %v1758_v18 }
 0x1de   :  { %4699 = vmatmul.mubr.msk.f32.gmra.mxu0 %vm36_vm4, %v6136_v44  ;;  %4676 = vmatmul.mubr.msk.f32.gmra.mxu1 %vm36_vm4, %v6138_v0  ;;  %v4666_v33 = vpop.f32.mrf.mxu0  ;;  %v2039_v19 = vrot.slane %v6138_v0, 7  ;;  %v6170_v25 = vsel %vm210_vm2, 0.0, %v2040_v39  ;;  %v2074_v52 = vrot.slane %v7042_v29, 1 }
 0x1df   :  { %4701 = vmatprep.mubr.msk.f32.mxu0 %vm36_vm4, %v6142_v20  ;;  %4678 = vmatprep.mubr.msk.f32.mxu1 %vm36_vm4, %v6126_v48  ;;  %2009 = vst.msk [vmem:[#allocation3 + $0x70] sm:$0xff] %vm36_vm4, %v1991_v32  ;;  %v1990_v30 = vmax.f32 %v1974_v8, 0.0  ;;  %v1977_v11 = vadd.f32 %v6012_v60, %v1954_v2  ;;  %v1953_v58 = vmul.f32 %v5997_v57, %v1930_v13  ;;  %v2075_v32 = vrot.slane %v6072_v6, 1 }
 0x1e0   :  { %v1933_v42 = vadd.f32 %v4666_v33, %v1761_v31  ;;  %v1909_v47 = vpop.f32.mrf.mxu0  ;;  %v6164_v35 = vsel %vm210_vm2, 0.0, %v2039_v19  ;;  %v6166_v21 = vld [vmem:[#allocation3 + $0x38] sm:$0xff]  ;;  %v2094_v15 = vsel %vm251_vm3, 0.0, %v2074_v52  ;;  %v2076_v13 = vrot.slane %v6064_v40, 1 }
 0x1e1   :  { %2008 = vst.msk [vmem:[#allocation3 + $0x68] sm:$0xff] %vm36_vm4, %v1990_v30  ;;  %v1993_v41 = vmax.f32 %v1977_v11, 0.0  ;;  %v1976_v4 = vadd.f32 %v6012_v60, %v1953_v58  ;;  %v1932_v5 = vadd.f32 %v1909_v47, %v1760_v14  ;;  %v2041_v1 = vrot.slane %v6166_v21, 7  ;;  %v6323_v47 = vld [vmem:[%s6944_s4 + $0x38] sm:$0xff] }
 0x1e2   :  { %v1956_v26 = vmul.f32 %v5997_v57, %v1933_v42  ;;  %4702 = vmatmul.mubr.msk.f32.gmra.mxu0 %vm36_vm4, %v6164_v35  ;;  %4679 = vmatmul.mubr.msk.f32.gmra.mxu1 %vm36_vm4, %v6166_v21  ;;  %v6184_v62 = vld [vmem:[#allocation3 + $0x60] sm:$0xff]  ;;  %v6283_v33 = vsel %vm251_vm3, 0.0, %v2075_v32  ;;  %v2077_v19 = vrot.slane %v6101_v63, 1  ;;  %v2078_v30 = vrot.slane %v6090_v7, 1 }
 0x1e3   :  { %4704 = vmatprep.mubr.msk.f32.mxu0 %vm36_vm4, %v6170_v25  ;;  %4681 = vmatprep.mubr.msk.f32.mxu1 %vm36_vm4, %v6131_v27  ;;  %2011 = vst.msk [vmem:[#allocation3 + $0x80] sm:$0xff] %vm36_vm4, %v1993_v41  ;;  %v1992_v56 = vmax.f32 %v1976_v4, 0.0  ;;  %v1955_v37 = vmul.f32 %v5997_v57, %v1932_v5  ;;  %v6193_v3 = vsel %vm210_vm2, 0.0, %v2041_v1  ;;  %v2046_v28 = vrot.slane %v6184_v62, 7 }
 0x1e4   :  { %v1979_v24 = vadd.f32 %v6012_v60, %v1956_v26  ;;  %v6195_v22 = vld [vmem:[#allocation3 + $0x58] sm:$0xff]  ;;  %v6301_v11 = vsel %vm251_vm3, 0.0, %v2076_v13  ;;  %v6308_v58 = vsel %vm251_vm3, 0.0, %v2077_v19  ;;  %v2079_v42 = vrot.slane %v6138_v0, 1  ;;  %v4108_v13 = vld [vmem:[%s6944_s4 + $0x40] sm:$0xff] }
 0x1e5   :  { %2010 = vst.msk [vmem:[#allocation3 + $0x78] sm:$0xff] %vm36_vm4, %v1992_v56  ;;  %v1978_v55 = vadd.f32 %v6012_v60, %v1955_v37  ;;  %v2045_v57 = vrot.slane %v6195_v22, 7  ;;  %v6224_v49 = vsel %vm210_vm2, 0.0, %v2046_v28  ;;  %v2084_v41 = vrot.slane %v6131_v27, 1  ;;  %v6345_v27 = vld [vmem:[#allocation3 + $0x40] sm:$0xff] }
 0x1e6   :  { %v1995_v54 = vmax.f32 %v1979_v24, 0.0  ;;  %4705 = vmatmul.mubr.msk.f32.gmra.mxu0 %vm36_vm4, %v6193_v3  ;;  %4682 = vmatmul.mubr.msk.f32.gmra.mxu1 %vm36_vm4, %v6195_v22  ;;  %v6208_v46 = vld [vmem:[#allocation3 + $0x70] sm:$0xff]  ;;  %v6333_v4 = vsel %vm251_vm3, 0.0, %v2079_v42  ;;  %v2081_v26 = vrot.slane %v6166_v21, 1  ;;  %v2042_v56 = vrot.slane %v6345_v27, 7 }
 0x1e7   :  { %4684 = vmatprep.mubr.msk.f32.mxu1 %vm36_vm4, %v6184_v62  ;;  %4707 = vmatprep.mubr.msk.f32.mxu0 %vm36_vm4, %v2064_v36  ;;  %v1994_v60 = vmax.f32 %v1978_v55, 0.0  ;;  %v6213_v61 = vsel %vm210_vm2, 0.0, %v2045_v57  ;;  %v2048_v23 = vrot.slane %v6208_v46, 7  ;;  %v2085_v24 = vrot.slane %v6195_v22, 1 }
 0x1e8   :  { %2013 = vst.msk [vmem:[#allocation3 + $0x90] sm:$0xff] %vm36_vm4, %v1995_v54  ;;  %v6215_v17 = vld [vmem:[#allocation3 + $0x68] sm:$0xff]  ;;  %v6355_v1 = vsel %vm251_vm3, 0.0, %v2081_v26  ;;  %v2086_v37 = vrot.slane %v6184_v62, 1  ;;  %v6369_v36 = vsel %vm210_vm2, 0.0, %v2042_v56  ;;  %v2088_v28 = vrot.slane %v6208_v46, 1 }
 0x1e9   :  { %2012 = vst.msk [vmem:[#allocation3 + $0x88] sm:$0xff] %vm36_vm4, %v1994_v60  ;;  %v2047_v18 = vrot.slane %v6215_v17, 7  ;;  %v6247_v59 = vsel %vm210_vm2, 0.0, %v2048_v23  ;;  %v2105_v54 = vsel %vm251_vm3, 0.0, %v2085_v24  ;;  %v2087_v55 = vrot.slane %v6215_v17, 1 }
 0x1ea   :  { %4708 = vmatmul.mubr.msk.f32.gmra.mxu0 %vm36_vm4, %v6213_v61  ;;  %4685 = vmatmul.mubr.msk.f32.gmra.mxu1 %vm36_vm4, %v6215_v17  ;;  %v6232_v38 = vld [vmem:[#allocation3 + $0x80] sm:$0xff]  ;;  %v6379_v57 = vsel %vm251_vm3, 0.0, %v2086_v37  ;;  %v6397_v23 = vsel %vm251_vm3, 0.0, %v2088_v28 }
 0x1eb   :  { %4710 = vmatprep.mubr.msk.f32.mxu0 %vm36_vm4, %v6224_v49  ;;  %4687 = vmatprep.mubr.msk.f32.mxu1 %vm36_vm4, %v6208_v46  ;;  %v6236_v43 = vsel %vm210_vm2, 0.0, %v2047_v18  ;;  %v2050_v51 = vrot.slane %v6232_v38, 7  ;;  %v6388_v60 = vsel %vm251_vm3, 0.0, %v2087_v55 }
 0x1ec   :  { %v6239_v10 = vld [vmem:[#allocation3 + $0x78] sm:$0xff] }
 0x1ed   :  { %v2049_v9 = vrot.slane %v6239_v10, 7  ;;  %v6270_v8 = vsel %vm210_vm2, 0.0, %v2050_v51  ;;  %v2089_v18 = vrot.slane %v6239_v10, 1 }
 0x1ee   :  { %4711 = vmatmul.mubr.msk.f32.gmra.mxu0 %vm36_vm4, %v6236_v43  ;;  %4688 = vmatmul.mubr.msk.f32.gmra.mxu1 %vm36_vm4, %v6239_v10 }
 0x1ef   :  { %4713 = vmatprep.mubr.msk.f32.mxu0 %vm36_vm4, %v6247_v59  ;;  %4690 = vmatprep.mubr.msk.f32.mxu1 %vm36_vm4, %v6232_v38  ;;  %v6257_v31 = vsel %vm210_vm2, 0.0, %v2049_v9  ;;  %v6406_v29 = vsel %vm251_vm3, 0.0, %v2089_v18  ;;  %v6417_v51 = vld [vmem:[#allocation3 + $0x90] sm:$0xff] }
 0x1f0   :  { %v6261_v39 = vld [vmem:[#allocation3 + $0x88] sm:$0xff]  ;;  %v2052_v32 = vrot.slane %v6417_v51, 7 }
 0x1f1   :  { %v2051_v2 = vrot.slane %v6261_v39, 7  ;;  %v2091_v52 = vrot.slane %v6261_v39, 1 }
 0x1f2   :  { %4714 = vmatmul.mubr.msk.f32.gmra.mxu0 %vm36_vm4, %v6257_v31  ;;  %4691 = vmatmul.mubr.msk.f32.gmra.mxu1 %vm36_vm4, %v6261_v39 }
 0x1f3   :  { %4716 = vmatprep.mubr.msk.f32.mxu0 %vm36_vm4, %v6270_v8  ;;  %4721 = vmatprep.mubr.msk.f32.mxu1 %vm36_vm4, %v2094_v15  ;;  %v6279_v14 = vsel %vm210_vm2, 0.0, %v2051_v2  ;;  %v6425_v15 = vsel %vm251_vm3, 0.0, %v2091_v52  ;;  %v6438_v2 = vsel %vm210_vm2, 0.0, %v2052_v32 }
 0x1f6   :  { %4717 = vmatmul.mubr.msk.f32.gmra.mxu0 %vm36_vm4, %v6279_v14  ;;  %4722 = vmatmul.mubr.msk.f32.vlgmr.msra.gmra.mxu1 %vm36_vm4, %v6283_v33 }
 0x1f7   :  { %4747 = vmatprep.mubr.msk.f32.mxu0 %vm36_vm4, %v6099_v34  ;;  %4772 = vmatpush3.msra.mxu1 %v6078_v53  ;;  %v6317_v53 = vsel %vm251_vm3, 0.0, %v2078_v30  ;;  %v2080_v34 = vrot.slane %v6126_v48, 1 }
 0x1f8   :  { %4724 = vmatprep.mubr.msk.f32.mxu1 %vm36_vm4, %v6301_v11  ;;  %4823 = vmatprep.subr.mxu1 %v6289_v45 }
 0x1f9   :  { %v6343_v5 = vsel %vm251_vm3, 0.0, %v2080_v34 }
 0x1fa   :  { %4748 = vmatmul.mubr.msk.f32.vlgmr.msra.gmra.mxu0 %vm36_vm4, %v6105_v16  ;;  %4725 = vmatmul.mubr.msk.f32.gmra.mxu1 %vm36_vm4, %v6308_v58 }
 0x1fb   :  { %4750 = vmatprep.mubr.msk.f32.mxu0 %vm36_vm4, %v6136_v44  ;;  %4727 = vmatprep.mubr.msk.f32.mxu1 %vm36_vm4, %v6317_v53 }
 0x1fc   :  { %4798 = vmatpush3.msra.mxu0 %v6118_v12  ;;  %v2104_v12 = vsel %vm251_vm3, 0.0, %v2084_v41 }
 0x1fd   :  { %4849 = vmatprep.subr.mxu0 %v6323_v47 }
 0x1fe   :  { %4751 = vmatmul.mubr.msk.f32.gmra.mxu0 %vm36_vm4, %v6142_v20  ;;  %4728 = vmatmul.mubr.msk.f32.gmra.mxu1 %vm36_vm4, %v6333_v4 }
 0x1ff   :  { %4753 = vmatprep.mubr.msk.f32.mxu0 %vm36_vm4, %v6164_v35  ;;  %4730 = vmatprep.mubr.msk.f32.mxu1 %vm36_vm4, %v6343_v5 }
 0x202   :  { %4754 = vmatmul.mubr.msk.f32.gmra.mxu0 %vm36_vm4, %v6170_v25  ;;  %4731 = vmatmul.mubr.msk.f32.gmra.mxu1 %vm36_vm4, %v6355_v1 }
 0x203   :  { %4756 = vmatprep.mubr.msk.f32.mxu0 %vm36_vm4, %v6193_v3  ;;  %4733 = vmatprep.mubr.msk.f32.mxu1 %vm36_vm4, %v2104_v12 }
 0x206   :  { %4757 = vmatmul.mubr.msk.f32.gmra.mxu0 %vm36_vm4, %v6369_v36  ;;  %4734 = vmatmul.mubr.msk.f32.gmra.mxu1 %vm36_vm4, %v2105_v54 }
 0x207   :  { %4759 = vmatprep.mubr.msk.f32.mxu0 %vm36_vm4, %v6213_v61  ;;  %4736 = vmatprep.mubr.msk.f32.mxu1 %vm36_vm4, %v6379_v57  ;;  %v2090_v61 = vrot.slane %v6232_v38, 1 }
 0x209   :  { %v6415_v9 = vsel %vm251_vm3, 0.0, %v2090_v61 }
 0x20a   :  { %4760 = vmatmul.mubr.msk.f32.gmra.mxu0 %vm36_vm4, %v6224_v49  ;;  %4737 = vmatmul.mubr.msk.f32.gmra.mxu1 %vm36_vm4, %v6388_v60 }
 0x20b   :  { %4762 = vmatprep.mubr.msk.f32.mxu0 %vm36_vm4, %v6236_v43  ;;  %4739 = vmatprep.mubr.msk.f32.mxu1 %vm36_vm4, %v6397_v23 }
 0x20e   :  { %4763 = vmatmul.mubr.msk.f32.gmra.mxu0 %vm36_vm4, %v6247_v59  ;;  %4740 = vmatmul.mubr.msk.f32.gmra.mxu1 %vm36_vm4, %v6406_v29 }
 0x20f   :  { %4765 = vmatprep.mubr.msk.f32.mxu0 %vm36_vm4, %v6257_v31  ;;  %4742 = vmatprep.mubr.msk.f32.mxu1 %vm36_vm4, %v6415_v9 }
 0x212   :  { %4766 = vmatmul.mubr.msk.f32.gmra.mxu0 %vm36_vm4, %v6270_v8  ;;  %4743 = vmatmul.mubr.msk.f32.gmra.mxu1 %vm36_vm4, %v6425_v15 }
 0x213   :  { %4768 = vmatprep.mubr.msk.f32.mxu0 %vm36_vm4, %v6279_v14  ;;  %4773 = vmatprep.mubr.msk.f32.mxu1 %vm36_vm4, %v6072_v6  ;;  %v2082_v6 = vrot.slane %v6345_v27, 1 }
 0x216   :  { %4769 = vmatmul.mubr.msk.f32.gmra.mxu0 %vm36_vm4, %v6438_v2  ;;  %4774 = vmatmul.mubr.msk.f32.vlgmr.msra.gmra.mxu1 %vm36_vm4, %v6064_v40 }
 0x217   :  { %4799 = vmatprep.mubr.msk.f32.mxu0 %vm36_vm4, %v6283_v33  ;;  %4824 = vmatpush3.msra.mxu1 %v6289_v45  ;;  %v6480_v33 = vsel %vm251_vm3, 0.0, %v2082_v6  ;;  %v2023_v45 = vld [vmem:[#allocation3 + $0x48] sm:$0xff] }
 0x218   :  { %4776 = vmatprep.mubr.msk.f32.mxu1 %vm36_vm4, %v6101_v63  ;;  %4875 = vmatprep.subr.mxu1 %v4108_v13 }
 0x21a   :  { %4800 = vmatmul.mubr.msk.f32.vlgmr.msra.gmra.mxu0 %vm36_vm4, %v6301_v11  ;;  %4777 = vmatmul.mubr.msk.f32.gmra.mxu1 %vm36_vm4, %v6090_v7 }
 0x21b   :  { %4802 = vmatprep.mubr.msk.f32.mxu0 %vm36_vm4, %v6308_v58  ;;  %4779 = vmatprep.mubr.msk.f32.mxu1 %vm36_vm4, %v6138_v0 }
 0x21c   :  { %4850 = vmatpush3.msra.mxu0 %v6323_v47 }
 0x21e   :  { %4803 = vmatmul.mubr.msk.f32.gmra.mxu0 %vm36_vm4, %v6317_v53  ;;  %4780 = vmatmul.mubr.msk.f32.gmra.mxu1 %vm36_vm4, %v6126_v48 }
 0x21f   :  { %4805 = vmatprep.mubr.msk.f32.mxu0 %vm36_vm4, %v6333_v4  ;;  %4782 = vmatprep.mubr.msk.f32.mxu1 %vm36_vm4, %v6166_v21 }
 0x222   :  { %4806 = vmatmul.mubr.msk.f32.gmra.mxu0 %vm36_vm4, %v6343_v5  ;;  %4783 = vmatmul.mubr.msk.f32.gmra.mxu1 %vm36_vm4, %v6345_v27 }
 0x223   :  { %4808 = vmatprep.mubr.msk.f32.mxu0 %vm36_vm4, %v6355_v1  ;;  %4785 = vmatprep.mubr.msk.f32.mxu1 %vm36_vm4, %v6195_v22  ;;  %v2092_v22 = vrot.slane %v6417_v51, 1 }
 0x225   :  { %v2112_v19 = vsel %vm251_vm3, 0.0, %v2092_v22 }
 0x226   :  { %4809 = vmatmul.mubr.msk.f32.gmra.mxu0 %vm36_vm4, %v6480_v33  ;;  %4786 = vmatmul.mubr.msk.f32.gmra.mxu1 %vm36_vm4, %v6184_v62 }
 0x227   :  { %4811 = vmatprep.mubr.msk.f32.mxu0 %vm36_vm4, %v2105_v54  ;;  %4788 = vmatprep.mubr.msk.f32.mxu1 %vm36_vm4, %v6215_v17 }
 0x22a   :  { %4812 = vmatmul.mubr.msk.f32.gmra.mxu0 %vm36_vm4, %v6379_v57  ;;  %4789 = vmatmul.mubr.msk.f32.gmra.mxu1 %vm36_vm4, %v6208_v46 }
 0x22b   :  { %4814 = vmatprep.mubr.msk.f32.mxu0 %vm36_vm4, %v6388_v60  ;;  %4791 = vmatprep.mubr.msk.f32.mxu1 %vm36_vm4, %v6239_v10 }
 0x22e   :  { %4815 = vmatmul.mubr.msk.f32.gmra.mxu0 %vm36_vm4, %v6397_v23  ;;  %4792 = vmatmul.mubr.msk.f32.gmra.mxu1 %vm36_vm4, %v6232_v38 }
 0x22f   :  { %4817 = vmatprep.mubr.msk.f32.mxu0 %vm36_vm4, %v6406_v29  ;;  %4794 = vmatprep.mubr.msk.f32.mxu1 %vm36_vm4, %v6261_v39 }
 0x232   :  { %4818 = vmatmul.mubr.msk.f32.gmra.mxu0 %vm36_vm4, %v6415_v9  ;;  %4795 = vmatmul.mubr.msk.f32.gmra.mxu1 %vm36_vm4, %v6417_v51 }
 0x233   :  { %4820 = vmatprep.mubr.msk.f32.mxu0 %vm36_vm4, %v6425_v15  ;;  %4825 = vmatprep.mubr.msk.f32.mxu1 %vm36_vm4, %v6105_v16  ;;  %v2043_v16 = vrot.slane %v2023_v45, 7 }
 0x236   :  { %4821 = vmatmul.mubr.msk.f32.gmra.mxu0 %vm36_vm4, %v2112_v19  ;;  %4826 = vmatmul.mubr.msk.f32.vlgmr.msra.gmra.mxu1 %vm36_vm4, %v6136_v44  ;;  %v2083_v44 = vrot.slane %v2023_v45, 1 }
 0x237   :  { %4851 = vmatprep.mubr.msk.f32.mxu0 %vm36_vm4, %v6064_v40  ;;  %4876 = vmatpush3.msra.mxu1 %v4108_v13  ;;  %v2063_v40 = vsel %vm210_vm2, 0.0, %v2043_v16 }
 0x238   :  { %4828 = vmatprep.mubr.msk.f32.mxu1 %vm36_vm4, %v6142_v20 }
 0x23a   :  { %4852 = vmatmul.mubr.msk.f32.vlgmr.msra.gmra.mxu0 %vm36_vm4, %v6101_v63  ;;  %4829 = vmatmul.mubr.msk.f32.gmra.mxu1 %vm36_vm4, %v6164_v35 }
 0x23b   :  { %4854 = vmatprep.mubr.msk.f32.mxu0 %vm36_vm4, %v6090_v7  ;;  %4831 = vmatprep.mubr.msk.f32.mxu1 %vm36_vm4, %v6170_v25  ;;  %v2033_v7 = vld [vmem:[#allocation3 + $0x98] sm:$0xff] }
 0x23c   :  { %v2053_v63 = vrot.slane %v2033_v7, 7  ;;  %v2093_v20 = vrot.slane %v2033_v7, 1 }
 0x23e   :  { %4855 = vmatmul.mubr.msk.f32.gmra.mxu0 %vm36_vm4, %v6138_v0  ;;  %4832 = vmatmul.mubr.msk.f32.gmra.mxu1 %vm36_vm4, %v6193_v3  ;;  %v2103_v0 = vsel %vm251_vm3, 0.0, %v2083_v44  ;;  %v2113_v35 = vsel %vm251_vm3, 0.0, %v2093_v20 }
 0x23f   :  { %4857 = vmatprep.mubr.msk.f32.mxu0 %vm36_vm4, %v6126_v48  ;;  %4834 = vmatprep.mubr.msk.f32.mxu1 %vm36_vm4, %v6369_v36  ;;  %v2073_v48 = vsel %vm210_vm2, 0.0, %v2053_v63 }
 0x242   :  { %4858 = vmatmul.mubr.msk.f32.gmra.mxu0 %vm36_vm4, %v6166_v21  ;;  %4835 = vmatmul.mubr.msk.f32.gmra.mxu1 %vm36_vm4, %v2063_v40 }
 0x243   :  { %4860 = vmatprep.mubr.msk.f32.mxu0 %vm36_vm4, %v6345_v27  ;;  %4837 = vmatprep.mubr.msk.f32.mxu1 %vm36_vm4, %v6224_v49 }
 0x246   :  { %4861 = vmatmul.mubr.msk.f32.gmra.mxu0 %vm36_vm4, %v2023_v45  ;;  %4838 = vmatmul.mubr.msk.f32.gmra.mxu1 %vm36_vm4, %v6236_v43 }
 0x247   :  { %4863 = vmatprep.mubr.msk.f32.mxu0 %vm36_vm4, %v6184_v62  ;;  %4840 = vmatprep.mubr.msk.f32.mxu1 %vm36_vm4, %v6247_v59 }
 0x24a   :  { %4864 = vmatmul.mubr.msk.f32.gmra.mxu0 %vm36_vm4, %v6215_v17  ;;  %4841 = vmatmul.mubr.msk.f32.gmra.mxu1 %vm36_vm4, %v6257_v31 }
 0x24b   :  { %4866 = vmatprep.mubr.msk.f32.mxu0 %vm36_vm4, %v6208_v46  ;;  %4843 = vmatprep.mubr.msk.f32.mxu1 %vm36_vm4, %v6270_v8 }
 0x24e   :  { %4867 = vmatmul.mubr.msk.f32.gmra.mxu0 %vm36_vm4, %v6239_v10  ;;  %4844 = vmatmul.mubr.msk.f32.gmra.mxu1 %vm36_vm4, %v6279_v14 }
 0x24f   :  { %4869 = vmatprep.mubr.msk.f32.mxu0 %vm36_vm4, %v6232_v38  ;;  %4846 = vmatprep.mubr.msk.f32.mxu1 %vm36_vm4, %v6438_v2 }
 0x252   :  { %4870 = vmatmul.mubr.msk.f32.gmra.mxu0 %vm36_vm4, %v6261_v39  ;;  %4847 = vmatmul.mubr.msk.f32.gmra.mxu1 %vm36_vm4, %v2073_v48 }
 0x253   :  { %4872 = vmatprep.mubr.msk.f32.mxu0 %vm36_vm4, %v6417_v51  ;;  %4877 = vmatprep.mubr.msk.f32.mxu1 %vm36_vm4, %v6301_v11 }
 0x256   :  { %4873 = vmatmul.mubr.msk.f32.gmra.mxu0 %vm36_vm4, %v2033_v7  ;;  %4878 = vmatmul.mubr.msk.f32.vlgmr.msra.gmra.mxu1 %vm36_vm4, %v6308_v58 }
 0x257   :  { %4880 = vmatprep.mubr.msk.f32.mxu1 %vm36_vm4, %v6317_v53 }
 0x25a   :  { %4881 = vmatmul.mubr.msk.f32.gmra.mxu1 %vm36_vm4, %v6333_v4 }
 0x25b   :  { %4883 = vmatprep.mubr.msk.f32.mxu1 %vm36_vm4, %v6343_v5 }
 0x25e   :  { %4884 = vmatmul.mubr.msk.f32.gmra.mxu1 %vm36_vm4, %v6355_v1 }
 0x25f   :  { %4886 = vmatprep.mubr.msk.f32.mxu1 %vm36_vm4, %v6480_v33 }
 0x262   :  { %4887 = vmatmul.mubr.msk.f32.gmra.mxu1 %vm36_vm4, %v2103_v0 }
 0x263   :  { %4889 = vmatprep.mubr.msk.f32.mxu1 %vm36_vm4, %v6379_v57 }
 0x266   :  { %4890 = vmatmul.mubr.msk.f32.gmra.mxu1 %vm36_vm4, %v6388_v60 }
 0x267   :  { %4892 = vmatprep.mubr.msk.f32.mxu1 %vm36_vm4, %v6397_v23 }
 0x26a   :  { %4893 = vmatmul.mubr.msk.f32.gmra.mxu1 %vm36_vm4, %v6406_v29 }
 0x26b   :  { %4895 = vmatprep.mubr.msk.f32.mxu1 %vm36_vm4, %v6415_v9 }
 0x26e   :  { %4896 = vmatmul.mubr.msk.f32.gmra.mxu1 %vm36_vm4, %v6425_v15 }
 0x26f   :  { %4898 = vmatprep.mubr.msk.f32.mxu1 %vm36_vm4, %v2112_v19 }
 0x272   :  { %4899 = vmatmul.mubr.msk.f32.gmra.mxu1 %vm36_vm4, %v2113_v35 }
 0x295   :  { %v4671_v21 = vpop.f32.mrf.mxu1 }
 0x297   :  { %v2231_v25 = vpop.f32.mrf.mxu1 }
 0x299   :  { %v4697_v62 = vpop.f32.mrf.mxu0 }
 0x29a   :  { %v4674_v3 = vpop.f32.mrf.mxu1  ;;  %v2430_v46 = vadd.f32 %v4697_v62, %v4671_v21 }
 0x29b   :  { %v2424_v17 = vpop.f32.mrf.mxu0 }
 0x29c   :  { %v2241_v49 = vpop.f32.mrf.mxu1  ;;  %v2425_v38 = vadd.f32 %v2424_v17, %v2231_v25 }
 0x29e   :  { %v4700_v43 = vpop.f32.mrf.mxu0  ;;  %v4677_v10 = vpop.f32.mrf.mxu1 }
 0x29f   :  { %v2440_v59 = vadd.f32 %v4700_v43, %v4674_v3 }
 0x2a0   :  { %v2434_v31 = vpop.f32.mrf.mxu0  ;;  %v2251_v39 = vpop.f32.mrf.mxu1 }
 0x2a1   :  { %v2435_v8 = vadd.f32 %v2434_v31, %v2241_v49 }
 0x2a2   :  { %v4703_v14 = vpop.f32.mrf.mxu0  ;;  %v4680_v30 = vpop.f32.mrf.mxu1 }
 0x2a3   :  { %v2450_v50 = vadd.f32 %v4703_v14, %v4677_v10 }
 0x2a4   :  { %v2444_v11 = vpop.f32.mrf.mxu0  ;;  %v2261_v58 = vpop.f32.mrf.mxu1 }
 0x2a5   :  { %v2445_v42 = vadd.f32 %v2444_v11, %v2251_v39 }
 0x2a6   :  { %v4706_v53 = vpop.f32.mrf.mxu0  ;;  %v4683_v34 = vpop.f32.mrf.mxu1 }
 0x2a7   :  { %v2460_v47 = vadd.f32 %v4706_v53, %v4680_v30 }
 0x2a8   :  { %v2454_v41 = vpop.f32.mrf.mxu0  ;;  %v2271_v4 = vpop.f32.mrf.mxu1 }
 0x2a9   :  { %v2455_v26 = vadd.f32 %v2454_v41, %v2261_v58 }
 0x2aa   :  { %v4709_v5 = vpop.f32.mrf.mxu0  ;;  %v4686_v27 = vpop.f32.mrf.mxu1 }
 0x2ab   :  { %v2470_v12 = vadd.f32 %v4709_v5, %v4683_v34 }
 0x2ac   :  { %v2464_v1 = vpop.f32.mrf.mxu0  ;;  %v2281_v56 = vpop.f32.mrf.mxu1 }
 0x2ad   :  { %v2465_v24 = vadd.f32 %v2464_v1, %v2271_v4 }
 0x2ae   :  { %v4712_v37 = vpop.f32.mrf.mxu0  ;;  %v4689_v36 = vpop.f32.mrf.mxu1 }
 0x2af   :  { %v2480_v54 = vadd.f32 %v4712_v37, %v4686_v27 }
 0x2b0   :  { %v2474_v55 = vpop.f32.mrf.mxu0  ;;  %v2291_v57 = vpop.f32.mrf.mxu1 }
 0x2b1   :  { %v2475_v28 = vadd.f32 %v2474_v55, %v2281_v56 }
 0x2b2   :  { %v4715_v60 = vpop.f32.mrf.mxu0  ;;  %v4692_v18 = vpop.f32.mrf.mxu1 }
 0x2b3   :  { %v2490_v23 = vadd.f32 %v4715_v60, %v4689_v36 }
 0x2b4   :  { %v2484_v61 = vpop.f32.mrf.mxu0  ;;  %v2301_v29 = vpop.f32.mrf.mxu1 }
 0x2b5   :  { %v2485_v52 = vadd.f32 %v2484_v61, %v2291_v57 }
 0x2b6   :  { %v4718_v9 = vpop.f32.mrf.mxu0  ;;  %v4723_v51 = vpop.f32.mrf.mxu1 }
 0x2b7   :  { %v2500_v15 = vadd.f32 %v4718_v9, %v4692_v18  ;;  %v6612_v32 = vadd.f32 %v4723_v51, %v2430_v46 }
 0x2b8   :  { %v2494_v2 = vpop.f32.mrf.mxu0  ;;  %v2619_v13 = vpop.f32.mrf.mxu1 }
 0x2b9   :  { %v2495_v6 = vadd.f32 %v2494_v2, %v2301_v29  ;;  %v6614_v33 = vadd.f32 %v2619_v13, %v2425_v38 }
 0x2ba   :  { %v6616_v22 = vpop.f32.mrf.mxu0  ;;  %v4726_v19 = vpop.f32.mrf.mxu1 }
 0x2bb   :  { %v6618_v45 = vadd.f32 %v4726_v19, %v2440_v59 }
 0x2bc   :  { %v6620_v16 = vpop.f32.mrf.mxu0  ;;  %v2629_v40 = vpop.f32.mrf.mxu1 }
 0x2bd   :  { %v6622_v7 = vadd.f32 %v2629_v40, %v2435_v8 }
 0x2be   :  { %v6624_v63 = vpop.f32.mrf.mxu0  ;;  %v4729_v48 = vpop.f32.mrf.mxu1 }
 0x2bf   :  { %v6626_v44 = vadd.f32 %v4729_v48, %v2450_v50 }
 0x2c0   :  { %v6628_v0 = vpop.f32.mrf.mxu0  ;;  %v2639_v20 = vpop.f32.mrf.mxu1 }
 0x2c1   :  { %v6630_v35 = vadd.f32 %v2639_v20, %v2445_v42 }
 0x2c2   :  { %v6632_v21 = vpop.f32.mrf.mxu0  ;;  %v4732_v25 = vpop.f32.mrf.mxu1 }
 0x2c3   :  { %v6634_v62 = vadd.f32 %v4732_v25, %v2460_v47 }
 0x2c4   :  { %v6636_v3 = vpop.f32.mrf.mxu0  ;;  %v2649_v46 = vpop.f32.mrf.mxu1 }
 0x2c5   :  { %v6638_v17 = vadd.f32 %v2649_v46, %v2455_v26 }
 0x2c6   :  { %v6640_v49 = vpop.f32.mrf.mxu0  ;;  %v4735_v38 = vpop.f32.mrf.mxu1 }
 0x2c7   :  { %v6642_v43 = vadd.f32 %v4735_v38, %v2470_v12 }
 0x2c8   :  { %v6644_v10 = vpop.f32.mrf.mxu0  ;;  %v2659_v59 = vpop.f32.mrf.mxu1 }
 0x2c9   :  { %v6646_v31 = vadd.f32 %v2659_v59, %v2465_v24 }
 0x2ca   :  { %v6648_v39 = vpop.f32.mrf.mxu0  ;;  %v4738_v8 = vpop.f32.mrf.mxu1 }
 0x2cb   :  { %v6650_v14 = vadd.f32 %v4738_v8, %v2480_v54 }
 0x2cc   :  { %v6652_v30 = vpop.f32.mrf.mxu0  ;;  %v2669_v50 = vpop.f32.mrf.mxu1 }
 0x2cd   :  { %v6654_v11 = vadd.f32 %v2669_v50, %v2475_v28 }
 0x2ce   :  { %v6656_v58 = vpop.f32.mrf.mxu0  ;;  %v4741_v42 = vpop.f32.mrf.mxu1 }
 0x2cf   :  { %v6658_v53 = vadd.f32 %v4741_v42, %v2490_v23 }
 0x2d0   :  { %v6660_v34 = vpop.f32.mrf.mxu0  ;;  %v2679_v47 = vpop.f32.mrf.mxu1 }
 0x2d1   :  { %v6662_v41 = vadd.f32 %v2679_v47, %v2485_v52 }
 0x2d2   :  { %v6664_v4 = vpop.f32.mrf.mxu0  ;;  %v4744_v26 = vpop.f32.mrf.mxu1 }
 0x2d3   :  { %v6666_v5 = vadd.f32 %v4744_v26, %v2500_v15 }
 0x2d4   :  { %v6668_v27 = vpop.f32.mrf.mxu0  ;;  %v2689_v12 = vpop.f32.mrf.mxu1 }
 0x2d5   :  { %v6670_v1 = vadd.f32 %v2689_v12, %v2495_v6 }
 0x2d6   :  { %v6672_v56 = vpop.f32.mrf.mxu0  ;;  %v4775_v24 = vpop.f32.mrf.mxu1 }
 0x2d8   :  { %v6674_v37 = vpop.f32.mrf.mxu0  ;;  %v2957_v36 = vpop.f32.mrf.mxu1 }
 0x2da   :  { %v4801_v54 = vpop.f32.mrf.mxu0  ;;  %v4778_v55 = vpop.f32.mrf.mxu1 }
 0x2dc   :  { %v3126_v57 = vpop.f32.mrf.mxu0  ;;  %v2967_v28 = vpop.f32.mrf.mxu1 }
 0x2de   :  { %v6676_v60 = vpop.f32.mrf.mxu0  ;;  %v4781_v18 = vpop.f32.mrf.mxu1 }
 0x2e0   :  { %v6678_v23 = vpop.f32.mrf.mxu0  ;;  %v6680_v61 = vpop.f32.mrf.mxu1 }
 0x2e2   :  { %v6682_v29 = vpop.f32.mrf.mxu0  ;;  %v6684_v52 = vpop.f32.mrf.mxu1 }
 0x2e4   :  { %v6686_v9 = vpop.f32.mrf.mxu0  ;;  %v6688_v51 = vpop.f32.mrf.mxu1 }
 0x2e6   :  { %v6690_v15 = vpop.f32.mrf.mxu0  ;;  %v6692_v2 = vpop.f32.mrf.mxu1 }
 0x2e7   :  { %7043 = vst [vmem:[#allocation14_spill] sm:$0xff] %v6690_v15  ;;  %7044 = vst [vmem:[#allocation16_spill] sm:$0xff] %v6692_v2  ;;  %v2868_v2 = vadd.f32 %v6616_v22, %v6612_v32 }
 0x2e8   :  { %v6694_v13 = vpop.f32.mrf.mxu0  ;;  %v6696_v6 = vpop.f32.mrf.mxu1 }
 0x2e9   :  { %7045 = vst [vmem:[#allocation37_spill] sm:$0xff] %v6694_v13  ;;  %7046 = vst [vmem:[#allocation8_spill] sm:$0xff] %v6696_v6 }
 0x2ea   :  { %v6698_v19 = vpop.f32.mrf.mxu0  ;;  %v6700_v40 = vpop.f32.mrf.mxu1 }
 0x2eb   :  { %7047 = vst [vmem:[#allocation9_spill] sm:$0xff] %v6698_v19  ;;  %7048 = vst [vmem:[#allocation15_spill] sm:$0xff] %v6700_v40 }
 0x2ec   :  { %v6702_v48 = vpop.f32.mrf.mxu0  ;;  %v6704_v20 = vpop.f32.mrf.mxu1 }
 0x2ed   :  { %7049 = vst [vmem:[#allocation18_spill] sm:$0xff] %v6702_v48  ;;  %7050 = vst [vmem:[#allocation20_spill] sm:$0xff] %v6704_v20 }
 0x2ee   :  { %v6706_v25 = vpop.f32.mrf.mxu0  ;;  %v6708_v46 = vpop.f32.mrf.mxu1 }
 0x2ef   :  { %7051 = vst [vmem:[#allocation11_spill] sm:$0xff] %v6706_v25  ;;  %7052 = vst [vmem:[#allocation38_spill] sm:$0xff] %v6708_v46 }
 0x2f0   :  { %v6710_v38 = vpop.f32.mrf.mxu0  ;;  %v6712_v59 = vpop.f32.mrf.mxu1 }
 0x2f1   :  { %7053 = vst [vmem:[#allocation39_spill] sm:$0xff] %v6710_v38  ;;  %7054 = vst [vmem:[#allocation10_spill] sm:$0xff] %v6712_v59 }
 0x2f2   :  { %v6714_v8 = vpop.f32.mrf.mxu0  ;;  %v6716_v50 = vpop.f32.mrf.mxu1 }
 0x2f3   :  { %7055 = vst [vmem:[#allocation12_spill] sm:$0xff] %v6714_v8  ;;  %7056 = vst [vmem:[#allocation13_spill] sm:$0xff] %v6716_v50 }
 0x2f4   :  { %v6718_v42 = vpop.f32.mrf.mxu0  ;;  %v6720_v47 = vpop.f32.mrf.mxu1 }
 0x2f5   :  { %7057 = vst [vmem:[#allocation17_spill] sm:$0xff] %v6718_v42  ;;  %7058 = vst [vmem:[#allocation41_spill] sm:$0xff] %v6720_v47 }
 0x2f6   :  { %v6722_v26 = vpop.f32.mrf.mxu0  ;;  %v4827_v12 = vpop.f32.mrf.mxu1 }
 0x2f7   :  { %7059 = vst [vmem:[#allocation19_spill] sm:$0xff] %v6722_v26 }
 0x2f8   :  { %v6724_v20 = vpop.f32.mrf.mxu0  ;;  %v3295_v25 = vpop.f32.mrf.mxu1 }
 0x2f9   :  { %7060 = vst [vmem:[#allocation40_spill] sm:$0xff] %v6724_v20 }
 0x2fa   :  { %v4853_v48 = vpop.f32.mrf.mxu0  ;;  %v4830_v46 = vpop.f32.mrf.mxu1 }
 0x2fc   :  { %v3464_v40 = vpop.f32.mrf.mxu0  ;;  %v3305_v38 = vpop.f32.mrf.mxu1 }
 0x2fe   :  { %v6726_v19 = vpop.f32.mrf.mxu0  ;;  %v4833_v59 = vpop.f32.mrf.mxu1 }
 0x300   :  { %v6728_v8 = vpop.f32.mrf.mxu0  ;;  %v6730_v50 = vpop.f32.mrf.mxu1 }
 0x301   :  { %7061 = vst [vmem:[#allocation21_spill] sm:$0xff] %v6728_v8  ;;  %7062 = vst [vmem:[#allocation22_spill] sm:$0xff] %v6730_v50  ;;  %v2867_v8 = vadd.f32 %v6620_v16, %v6614_v33  ;;  %v3037_v50 = vadd.f32 %v4775_v24, %v2868_v2  ;;  %v2872_v33 = vadd.f32 %v6632_v21, %v6626_v44 }
 0x302   :  { %v6732_v42 = vpop.f32.mrf.mxu1  ;;  %v6734_v47 = vpop.f32.mrf.mxu0  ;;  %v2873_v44 = vadd.f32 %v6644_v10, %v6638_v17  ;;  %v2876_v21 = vadd.f32 %v6648_v39, %v6642_v43  ;;  %v2877_v17 = vadd.f32 %v6660_v34, %v6654_v11  ;;  %v6794_v39 = vld [vmem:[%s6947_s5] ss:$0 sm:$0xff]  ;;  %v6802_v11 = vadd.f32 %v6668_v27, %v6662_v41 }
 0x303   :  { %7063 = vst [vmem:[#allocation23_spill] sm:$0xff] %v6732_v42  ;;  %7064 = vst [vmem:[#allocation42_spill] sm:$0xff] %v6734_v47  ;;  %v3206_v32 = vadd.f32 %v4801_v54, %v3037_v50 }
 0x304   :  { %v6736_v26 = vpop.f32.mrf.mxu1  ;;  %v6740_v20 = vpop.f32.mrf.mxu0  ;;  %v3042_v34 = vadd.f32 %v6688_v51, %v2873_v44  ;;  %v7071_v51 = vld [vmem:[#allocation14_spill] sm:$0xff]  ;;  %v7080_v44 = vld [vmem:[#allocation15_spill] sm:$0xff] }
 0x305   :  { %7065 = vst [vmem:[#allocation24_spill] sm:$0xff] %v6736_v26  ;;  %7067 = vst [vmem:[#allocation44_spill] sm:$0xff] %v6740_v20  ;;  %v3036_v26 = vadd.f32 %v2957_v36, %v2867_v8 }
 0x306   :  { %v6738_v6 = vpop.f32.mrf.mxu1  ;;  %v6750_v42 = vpop.f32.mrf.mxu0 }
 0x307   :  { %7066 = vst [vmem:[#allocation26_spill] sm:$0xff] %v6738_v6  ;;  %v2870_v6 = vadd.f32 %v6624_v63, %v6618_v45  ;;  %v3205_v24 = vadd.f32 %v3126_v57, %v3036_v26  ;;  %v2871_v45 = vadd.f32 %v6636_v3, %v6630_v35  ;;  %v3041_v63 = vadd.f32 %v4781_v18, %v2872_v33 }
 0x308   :  { %v6742_v13 = vpop.f32.mrf.mxu1  ;;  %v2875_v3 = vadd.f32 %v6652_v30, %v6646_v31  ;;  %v2880_v31 = vadd.f32 %v6664_v4, %v6658_v53  ;;  %v6813_v4 = vadd.f32 %v6672_v56, %v6666_v5 }
 0x309   :  { %7068 = vst [vmem:[#allocation43_spill] sm:$0xff] %v6742_v13  ;;  %v2869_v13 = vadd.f32 %v6628_v0, %v6622_v7  ;;  %v3039_v22 = vadd.f32 %v4778_v55, %v2870_v6  ;;  %v3374_v0 = vadd.f32 %v3295_v25, %v3205_v24  ;;  %v2874_v55 = vadd.f32 %v6640_v49, %v6634_v62  ;;  %v7073_v25 = vld [vmem:[#allocation22_spill] sm:$0xff] }
 0x30a   :  { %v6746_v15 = vpop.f32.mrf.mxu1  ;;  %v3040_v57 = vadd.f32 %v6680_v61, %v2871_v45  ;;  %v2878_v62 = vadd.f32 %v6656_v58, %v6650_v14  ;;  %v3210_v49 = vadd.f32 %v6682_v29, %v3041_v63 }
 0x30b   :  { %7069 = vst [vmem:[#allocation25_spill] sm:$0xff] %v6746_v15  ;;  %v6760_v15 = vpop.f32.mrf.mxu0  ;;  %v3038_v2 = vadd.f32 %v2967_v28, %v2869_v13  ;;  %v3208_v7 = vadd.f32 %v6676_v60, %v3039_v22  ;;  %v3043_v43 = vadd.f32 %v6684_v52, %v2874_v55  ;;  %v3543_v30 = vadd.f32 %v3464_v40, %v3374_v0  ;;  %v6809_v52 = vld [vmem:[%s6948_s6] ss:$0 sm:$0xff]  ;;  %v7078_v22 = vld [vmem:[#allocation23_spill] sm:$0xff]  ;;  %v7079_v0 = vld [vmem:[#allocation9_spill] sm:$0xff] }
 0x30c   :  { %v6752_v47 = vpop.f32.mrf.mxu1  ;;  %v3209_v58 = vadd.f32 %v6686_v9, %v3040_v57  ;;  %v3379_v29 = vadd.f32 %v4833_v59, %v3210_v49  ;;  %v6819_v9 = vadd.f32 %v6674_v37, %v6670_v1  ;;  %v7072_v40 = vld [vmem:[#allocation16_spill] sm:$0xff]  ;;  %v7074_v59 = vld [vmem:[#allocation21_spill] sm:$0xff] }
 0x30d   :  { %7070 = vst [vmem:[#allocation28_spill] sm:$0xff] %v6752_v47  ;;  %v3375_v47 = vadd.f32 %v4827_v12, %v3206_v32  ;;  %v6771_v54 = vpop.f32.mrf.mxu0  ;;  %v3207_v28 = vadd.f32 %v6678_v23, %v3038_v2  ;;  %v3377_v18 = vadd.f32 %v4830_v46, %v3208_v7  ;;  %v3212_v6 = vadd.f32 %v7071_v51, %v3043_v43  ;;  %v7076_v1 = vld [vmem:[#allocation8_spill] sm:$0xff]  ;;  %v7077_v12 = vld [vmem:[#allocation42_spill] sm:$0xff] }
 0x30e   :  { %v6756_v20 = vpop.f32.mrf.mxu1  ;;  %v3378_v46 = vadd.f32 %v7073_v25, %v3209_v58  ;;  %v3044_v37 = vadd.f32 %v7076_v1, %v2875_v3  ;;  %v3548_v32 = vadd.f32 %v7077_v12, %v3379_v29  ;;  %v7081_v57 = vld [vmem:[#allocation44_spill] sm:$0xff]  ;;  %v7089_v1 = vld [vmem:[#allocation39_spill] sm:$0xff] }
 0x30f   :  { %v3544_v60 = vadd.f32 %v4853_v48, %v3375_v47  ;;  %v3376_v23 = vadd.f32 %v3305_v38, %v3207_v28  ;;  %v6798_v61 = vpop.f32.mrf.mxu0  ;;  %v3546_v13 = vadd.f32 %v6726_v19, %v3377_v18  ;;  %v3045_v48 = vadd.f32 %v7072_v40, %v2876_v21  ;;  %v7075_v47 = vld [vmem:[#allocation37_spill] sm:$0xff] }
 0x310   :  { %v6764_v16 = vpop.f32.mrf.mxu1  ;;  %v3211_v26 = vadd.f32 %v7075_v47, %v3042_v34  ;;  %v3381_v33 = vadd.f32 %v7078_v22, %v3212_v6  ;;  %v3047_v21 = vadd.f32 %v7080_v44, %v2878_v62  ;;  %v3547_v28 = vadd.f32 %v7081_v57, %v3378_v46  ;;  %v7084_v34 = vld [vmem:[#allocation20_spill] sm:$0xff]  ;;  %v7087_v46 = vld [vmem:[#allocation38_spill] sm:$0xff] }
 0x311   :  { %v3545_v8 = vadd.f32 %v7074_v59, %v3376_v23  ;;  %v6825_v5 = vpop.f32.mrf.mxu0  ;;  %v3214_v55 = vadd.f32 %v7079_v0, %v3045_v48  ;;  %v3046_v62 = vadd.f32 %v7084_v34, %v2877_v17  ;;  %v7086_v48 = vld [vmem:[#allocation11_spill] sm:$0xff] }
 0x312   :  { %v6768_v36 = vpop.f32.mrf.mxu1  ;;  %v3550_v29 = vadd.f32 %v6750_v42, %v3381_v33  ;;  %v3216_v25 = vadd.f32 %v7086_v48, %v3047_v21  ;;  %v7088_v42 = vld [vmem:[#allocation43_spill] sm:$0xff] }
 0x313   :  { %v3514_v49 = vpop.f32.mrf.mxu0 }
 0x314   :  { %v6780_v35 = vpop.f32.mrf.mxu1  ;;  %v7094_v44 = vld [vmem:[#allocation28_spill] sm:$0xff] }
 0x316   :  { %v4879_v10 = vpop.f32.mrf.mxu1 }
 0x317   :  { %v3713_v14 = vadd.f32 %v4879_v10, %v3544_v60  ;;  %v7082_v60 = vld [vmem:[#allocation24_spill] sm:$0xff] }
 0x318   :  { %v3633_v53 = vpop.f32.mrf.mxu1  ;;  %v3380_v18 = vadd.f32 %v7082_v60, %v3211_v26 }
 0x319   :  { %v3736_v41 = vmul.f32 %v6794_v39, %v3713_v14  ;;  %v3712_v27 = vadd.f32 %v3633_v53, %v3543_v30  ;;  %v7083_v14 = vld [vmem:[#allocation18_spill] sm:$0xff] }
 0x31a   :  { %v4882_v38 = vpop.f32.mrf.mxu1  ;;  %v3213_v58 = vadd.f32 %v7083_v14, %v3044_v37  ;;  %v7085_v53 = vld [vmem:[#allocation26_spill] sm:$0xff]  ;;  %v3549_v17 = vadd.f32 %v6760_v15, %v3380_v18  ;;  %v3215_v37 = vadd.f32 %v7089_v1, %v3046_v62 }
 0x31b   :  { %v3759_v56 = vadd.f32 %v6809_v52, %v3736_v41  ;;  %v3735_v19 = vmul.f32 %v6794_v39, %v3712_v27  ;;  %v3715_v50 = vadd.f32 %v4882_v38, %v3546_v13  ;;  %v3383_v13 = vadd.f32 %v7085_v53, %v3214_v55  ;;  %v7093_v55 = vld [vmem:[#allocation13_spill] sm:$0xff] }
 0x31c   :  { %v3643_v24 = vpop.f32.mrf.mxu1  ;;  %v3049_v38 = vadd.f32 %v7087_v46, %v2880_v31  ;;  %v3382_v59 = vadd.f32 %v7088_v42, %v3213_v58  ;;  %v7090_v31 = vld [vmem:[#allocation10_spill] sm:$0xff]  ;;  %v3384_v21 = vadd.f32 %v7094_v44, %v3215_v37 }
 0x31d   :  { %v3775_v2 = vmax.f32 %v3759_v56, 0.0  ;;  %v3758_v45 = vadd.f32 %v6809_v52, %v3735_v19  ;;  %v3738_v63 = vmul.f32 %v6794_v39, %v3715_v50  ;;  %v3714_v7 = vadd.f32 %v3643_v24, %v3545_v8  ;;  %v4871_v56 = vpop.f32.mrf.mxu0 }
 0x31e   :  { %v4885_v3 = vpop.f32.mrf.mxu1  ;;  %v3048_v12 = vadd.f32 %v7090_v31, %v6802_v11  ;;  %v3552_v15 = vadd.f32 %v6771_v54, %v3383_v13  ;;  %v3051_v11 = vadd.f32 %v7093_v55, %v6813_v4  ;;  %v3551_v54 = vadd.f32 %v6798_v61, %v3382_v59  ;;  %v7096_v4 = vld [vmem:[#allocation41_spill] sm:$0xff]  ;;  %v7097_v13 = vld [vmem:[#allocation19_spill] sm:$0xff] }
 0x31f   :  { %3791 = vst [vmem:[%s6949_s7 + $0x8] sm:$0xff] %v3775_v2  ;;  %v3774_v43 = vmax.f32 %v3758_v45, 0.0  ;;  %v3761_v10 = vadd.f32 %v6809_v52, %v3738_v63  ;;  %v3737_v30 = vmul.f32 %v6794_v39, %v3714_v7  ;;  %v3717_v23 = vadd.f32 %v4885_v3, %v3548_v32  ;;  %v7091_v32 = vld [vmem:[#allocation25_spill] sm:$0xff]  ;;  %v7092_v7 = vld [vmem:[#allocation12_spill] sm:$0xff] }
 0x320   :  { %v3653_v41 = vpop.f32.mrf.mxu1  ;;  %v3385_v22 = vadd.f32 %v7091_v32, %v3216_v25  ;;  %v3218_v0 = vadd.f32 %v7092_v7, %v3049_v38  ;;  %v7098_v25 = vld [vmem:[#allocation40_spill] sm:$0xff] }
 0x321   :  { %3790 = vst [vmem:[%s6949_s7] sm:$0xff] %v3774_v43  ;;  %v3777_v27 = vmax.f32 %v3761_v10, 0.0  ;;  %v3760_v51 = vadd.f32 %v6809_v52, %v3737_v30  ;;  %v3740_v6 = vmul.f32 %v6794_v39, %v3717_v23  ;;  %v3716_v40 = vadd.f32 %v3653_v41, %v3547_v28  ;;  %v3524_v28 = vpop.f32.mrf.mxu0  ;;  %v7095_v10 = vld [vmem:[#allocation17_spill] sm:$0xff] }
 0x322   :  { %v4888_v8 = vpop.f32.mrf.mxu1  ;;  %v3217_v30 = vadd.f32 %v7095_v10, %v3048_v12  ;;  %v3050_v23 = vadd.f32 %v7096_v4, %v6819_v9  ;;  %v3554_v61 = vadd.f32 %v6825_v5, %v3385_v22  ;;  %v3387_v14 = vadd.f32 %v6756_v20, %v3218_v0 }
 0x323   :  { %3793 = vst [vmem:[%s6949_s7 + $0x18] sm:$0xff] %v3777_v27  ;;  %v3776_v19 = vmax.f32 %v3760_v51, 0.0  ;;  %v3763_v50 = vadd.f32 %v6809_v52, %v3740_v6  ;;  %v3739_v47 = vmul.f32 %v6794_v39, %v3716_v40  ;;  %v3719_v26 = vadd.f32 %v4888_v8, %v3550_v29  ;;  %v4874_v5 = vpop.f32.mrf.mxu0 }
 0x324   :  { %v3663_v33 = vpop.f32.mrf.mxu1  ;;  %v3220_v41 = vadd.f32 %v7097_v13, %v3051_v11  ;;  %v3553_v27 = vadd.f32 %v3514_v49, %v3384_v21  ;;  %v3386_v9 = vadd.f32 %v6764_v16, %v3217_v30  ;;  %v3219_v46 = vadd.f32 %v7098_v25, %v3050_v23 }
 0x325   :  { %3792 = vst [vmem:[%s6949_s7 + $0x10] sm:$0xff] %v3776_v19  ;;  %v3779_v24 = vmax.f32 %v3763_v50, 0.0  ;;  %v3762_v2 = vadd.f32 %v6809_v52, %v3739_v47  ;;  %v3742_v45 = vmul.f32 %v6794_v39, %v3719_v26  ;;  %v3718_v63 = vadd.f32 %v3663_v33, %v3549_v17  ;;  %v3534_v26 = vpop.f32.mrf.mxu0 }
 0x326   :  { %v4891_v57 = vpop.f32.mrf.mxu1  ;;  %v3556_v38 = vadd.f32 %v4871_v56, %v3387_v14  ;;  %v3389_v17 = vadd.f32 %v6768_v36, %v3220_v41  ;;  %v3555_v19 = vadd.f32 %v3524_v28, %v3386_v9  ;;  %v3388_v50 = vadd.f32 %v6780_v35, %v3219_v46 }
 0x327   :  { %3795 = vst [vmem:[%s6949_s7 + $0x28] sm:$0xff] %v3779_v24  ;;  %v3778_v60 = vmax.f32 %v3762_v2, 0.0  ;;  %v3765_v18 = vadd.f32 %v6809_v52, %v3742_v45  ;;  %v3741_v3 = vmul.f32 %v6794_v39, %v3718_v63  ;;  %v3721_v43 = vadd.f32 %v4891_v57, %v3552_v15 }
 0x328   :  { %v3673_v58 = vpop.f32.mrf.mxu1  ;;  %v3558_v31 = vadd.f32 %v4874_v5, %v3389_v17  ;;  %v3557_v33 = vadd.f32 %v3534_v26, %v3388_v50 }
 0x329   :  { %3794 = vst [vmem:[%s6949_s7 + $0x20] sm:$0xff] %v3778_v60  ;;  %v3781_v34 = vmax.f32 %v3765_v18, 0.0  ;;  %v3764_v62 = vadd.f32 %v6809_v52, %v3741_v3  ;;  %v3744_v29 = vmul.f32 %v6794_v39, %v3721_v43  ;;  %v3720_v53 = vadd.f32 %v3673_v58, %v3551_v54 }
 0x32a   :  { %v4894_v51 = vpop.f32.mrf.mxu1 }
 0x32b   :  { %3797 = vst [vmem:[%s6949_s7 + $0x38] sm:$0xff] %v3781_v34  ;;  %v3780_v20 = vmax.f32 %v3764_v62, 0.0  ;;  %v3767_v6 = vadd.f32 %v6809_v52, %v3744_v29  ;;  %v3743_v40 = vmul.f32 %v6794_v39, %v3720_v53  ;;  %v3723_v48 = vadd.f32 %v4894_v51, %v3554_v61 }
 0x32c   :  { %v3683_v49 = vpop.f32.mrf.mxu1 }
 0x32d   :  { %3796 = vst [vmem:[%s6949_s7 + $0x30] sm:$0xff] %v3780_v20  ;;  %v3783_v16 = vmax.f32 %v3767_v6, 0.0  ;;  %v3766_v42 = vadd.f32 %v6809_v52, %v3743_v40  ;;  %v3746_v59 = vmul.f32 %v6794_v39, %v3723_v48  ;;  %v3722_v8 = vadd.f32 %v3683_v49, %v3553_v27 }
 0x32e   :  { %v4897_v47 = vpop.f32.mrf.mxu1 }
 0x32f   :  { %3799 = vst [vmem:[%s6949_s7 + $0x48] sm:$0xff] %v3783_v16  ;;  %v3782_v36 = vmax.f32 %v3766_v42, 0.0  ;;  %v3769_v56 = vadd.f32 %v6809_v52, %v3746_v59  ;;  %v3745_v1 = vmul.f32 %v6794_v39, %v3722_v8  ;;  %v3725_v37 = vadd.f32 %v4897_v47, %v3556_v38 }
 0x330   :  { %v3693_v12 = vpop.f32.mrf.mxu1 }
 0x331   :  { %3798 = vst [vmem:[%s6949_s7 + $0x40] sm:$0xff] %v3782_v36  ;;  %v3785_v15 = vmax.f32 %v3769_v56, 0.0  ;;  %v3768_v35 = vadd.f32 %v6809_v52, %v3745_v1  ;;  %v3748_v32 = vmul.f32 %v6794_v39, %v3725_v37  ;;  %v3724_v22 = vadd.f32 %v3693_v12, %v3555_v19 }
 0x332   :  { %v4900_v24 = vpop.f32.mrf.mxu1 }
 0x333   :  { %3801 = vst [vmem:[%s6949_s7 + $0x58] sm:$0xff] %v3785_v15  ;;  %v3784_v2 = vmax.f32 %v3768_v35, 0.0  ;;  %v3771_v45 = vadd.f32 %v6809_v52, %v3748_v32  ;;  %v3747_v63 = vmul.f32 %v6794_v39, %v3724_v22  ;;  %v3727_v7 = vadd.f32 %v4900_v24, %v3558_v31 }
 0x334   :  { %v3703_v0 = vpop.f32.mrf.mxu1 }
 0x335   :  { %3800 = vst [vmem:[%s6949_s7 + $0x50] sm:$0xff] %v3784_v2  ;;  %v3787_v55 = vmax.f32 %v3771_v45, 0.0  ;;  %v3770_v11 = vadd.f32 %v6809_v52, %v3747_v63  ;;  %v3750_v54 = vmul.f32 %v6794_v39, %v3727_v7  ;;  %v3726_v44 = vadd.f32 %v3703_v0, %v3557_v33 }
 0x337   :  { %3803 = vst [vmem:[%s6949_s7 + $0x68] sm:$0xff] %v3787_v55  ;;  %v3786_v21 = vmax.f32 %v3770_v11, 0.0  ;;  %v3773_v57 = vadd.f32 %v6809_v52, %v3750_v54  ;;  %v3749_v28 = vmul.f32 %v6794_v39, %v3726_v44 }
 0x339   :  { %3802 = vst [vmem:[%s6949_s7 + $0x60] sm:$0xff] %v3786_v21  ;;  %v3789_v60 = vmax.f32 %v3773_v57, 0.0  ;;  %v3772_v18 = vadd.f32 %v6809_v52, %v3749_v28 }
 0x33b   :  { %3805 = vst [vmem:[%s6949_s7 + $0x78] sm:$0xff] %v3789_v60  ;;  %v3788_v3 = vmax.f32 %v3772_v18, 0.0 }
 0x33d   :  { %3804 = vst [vmem:[%s6949_s7 + $0x70] sm:$0xff] %v3788_v3 }

</bundles_post_ra>
